<compile_context>
chip_gen: v5e
topology: v5e:2x2
jax: 0.10.0
libtpu: 0.0.40
codegen_flags: <defaults>
</compile_context>

<pallas_src>
import jax
import jax.numpy as jnp
import numpy as np
from jax import lax
from jax.experimental import pallas as pl
from jax.experimental.pallas import tpu as pltpu

BN_EPS = 1e-5


def _encoder_kernel(feat_ref, w_ref, p_ref, out_ref):
  """Single-step kernel: pool -> linear -> BatchNorm1d (batch stats).

  feat_ref : (B, HW, C)  pre-pool feature map, channel-last (lane-dense)
  w_ref    : (C, E)      linear weight, transposed, pre-scaled by 1/HW
  p_ref    : (3, E)      packed [bias; bn_gamma; bn_beta]
  out_ref  : (B, E)      final features
  """
  # Global average pool: sum over the spatial (sublane) axis; the 1/HW factor
  # is already folded into the frozen weight.
  feat = feat_ref[...].astype(jnp.float32)                  # (B, HW, C)
  pooled = jnp.sum(feat, axis=1)                            # (B, C)

  # Linear (single K=C contraction on the MXU).
  y = jnp.dot(pooled, w_ref[...].astype(jnp.float32),
              preferred_element_type=jnp.float32)           # (B, E)

  p = p_ref[...].astype(jnp.float32)                        # (3, E)
  y = y + p[0:1, :]                                         # + linear bias

  # BatchNorm1d, training mode: biased batch mean/var over the batch axis.
  mean = jnp.mean(y, axis=0, keepdims=True)
  centered = y - mean
  var = jnp.mean(centered * centered, axis=0, keepdims=True)
  norm = centered * lax.rsqrt(var + BN_EPS)
  out_ref[...] = (norm * p[1:2, :] + p[2:3, :]).astype(out_ref.dtype)


def prepare_encoder_params(w_t, bias, gamma, beta, hw):
  """One-time, offline parameter prep for the frozen layers.

  Folds the spatial-mean factor 1/HW into the linear weight and packs the
  three tiny per-feature vectors into a single (3, E) array (one DMA).
  """
  e = w_t.shape[1]
  w_scaled = (w_t * (1.0 / float(hw))).astype(w_t.dtype)
  params = jnp.stack([bias, gamma, beta], axis=0).reshape(3, e)
  return w_scaled, params


def encoder_cnn_forward(feat_nchw, w_scaled_t, params):
  """features = BN(Linear(flatten(avgpool(feat_nchw)))), single kernel call."""
  b, c, h, w = feat_nchw.shape
  hw = h * w
  e = w_scaled_t.shape[1]

  # Layout plumbing (outside the kernel): channel-last so the lane axis is C
  # (multiple of 128 -> unmasked loads) and the pool reduces over sublanes.
  feat = feat_nchw.reshape(b, c, hw).transpose(0, 2, 1)     # (B, HW, C)

  itemsize = feat.dtype.itemsize
  cost = pl.CostEstimate(
      flops=int(2 * b * c * e + b * hw * c),
      transcendentals=0,
      bytes_accessed=int(feat.size * itemsize
                         + w_scaled_t.size * w_scaled_t.dtype.itemsize
                         + params.size * params.dtype.itemsize
                         + b * e * 4),
  )

  return pl.pallas_call(
      _encoder_kernel,
      out_shape=jax.ShapeDtypeStruct((b, e), jnp.float32),
      grid_spec=pltpu.PrefetchScalarGridSpec(
          num_scalar_prefetch=0,
          grid=(1,),                                        # single step
          in_specs=[
              pl.BlockSpec((b, hw, c), lambda i: (0, 0, 0)),  # feature map
              pl.BlockSpec((c, e), lambda i: (0, 0)),         # scaled weight
              pl.BlockSpec((3, e), lambda i: (0, 0)),         # packed params
          ],
          out_specs=pl.BlockSpec((b, e), lambda i: (0, 0)),
      ),
      compiler_params=pltpu.CompilerParams(
          dimension_semantics=("arbitrary",)),
      cost_estimate=cost,
  )(feat, w_scaled_t, params)


def _reference(feat_nchw, w_t, bias, gamma, beta):
  """Pure-JAX reference matching the PyTorch forward semantics."""
  b = feat_nchw.shape[0]
  pooled = jnp.mean(feat_nchw, axis=(2, 3))                 # AdaptiveAvgPool2d
  flat = pooled.reshape(b, -1)                              # reshape(B, -1)
  y = flat @ w_t + bias                                     # Linear
  mean = jnp.mean(y, axis=0, keepdims=True)                 # BatchNorm1d train
  var = jnp.mean((y - mean) ** 2, axis=0, keepdims=True)
  return (y - mean) / jnp.sqrt(var + BN_EPS) * gamma + beta


if __name__ == "__main__":
  B, C, H, W = 4, 2048, 4, 4          # C = resnet.fc.in_features
  EMBED = 32

  key = jax.random.PRNGKey(0)
  k_feat, k_w, k_b = jax.random.split(key, 3)

  # Stand-in for the frozen ResNet-50 trunk output (pre-avgpool feature map).
  feat = jax.random.normal(k_feat, (B, C, H, W), dtype=jnp.float32)

  # Linear params (PyTorch-style uniform(-1/sqrt(C), 1/sqrt(C))).
  bound = 1.0 / np.sqrt(C)
  w_t = jax.random.uniform(k_w, (C, EMBED), jnp.float32, -bound, bound)
  bias = jax.random.uniform(k_b, (EMBED,), jnp.float32, -bound, bound)
  # BatchNorm1d default init.
  gamma = jnp.ones((EMBED,), jnp.float32)
  beta = jnp.zeros((EMBED,), jnp.float32)

  # One-time offline prep of the frozen parameters (not in the per-call path).
  w_scaled, params = prepare_encoder_params(w_t, bias, gamma, beta, H * W)
  w_scaled = jax.block_until_ready(w_scaled)
  params = jax.block_until_ready(params)

  out = encoder_cnn_forward(feat, w_scaled, params)
  out = jax.block_until_ready(out)

  ref = jax.block_until_ready(_reference(feat, w_t, bias, gamma, beta))
  np.testing.assert_allclose(np.asarray(out), np.asarray(ref),
                             rtol=1e-3, atol=1e-3)
  print("KERNEL_OK")
</pallas_src>

<mosaic_0001>
module attributes {stable_mosaic.version = 11 : i64} {
  func.func @_encoder_kernel(%arg0: i32, %arg1: memref<4x16x2048xf32, #tpu.memory_space<vmem>>, %arg2: memref<2048x32xf32, #tpu.memory_space<vmem>>, %arg3: memref<3x32xf32, #tpu.memory_space<vmem>>, %arg4: memref<4x32xf32, #tpu.memory_space<vmem>>) attributes {dimension_semantics = [#tpu.dimension_semantics<arbitrary>], iteration_bounds = array<i64: 1>, scalar_prefetch = 0 : i64, scratch_operands = 0 : i64, tpu.core_type = #tpu.core_type<tc>, window_params = [{pipeline_mode = #tpu.pipeline_mode<synchronous>, transform_indices = @transform_0, window_bounds = array<i64: 4, 16, 2048>}, {pipeline_mode = #tpu.pipeline_mode<synchronous>, transform_indices = @transform_1, window_bounds = array<i64: 2048, 32>}, {pipeline_mode = #tpu.pipeline_mode<synchronous>, transform_indices = @transform_2, window_bounds = array<i64: 3, 32>}, {pipeline_mode = #tpu.pipeline_mode<synchronous>, transform_indices = @transform_3, window_bounds = array<i64: 4, 32>}]} {
    %c0 = arith.constant 0 : index
    %c0_0 = arith.constant 0 : index
    %c0_1 = arith.constant 0 : index
    %0 = vector.load %arg1[%c0, %c0_0, %c0_1] : memref<4x16x2048xf32, #tpu.memory_space<vmem>>, vector<4x16x2048xf32>
    %cst = arith.constant dense<0.000000e+00> : vector<4x2048xf32>
    %1 = vector.multi_reduction <add>, %0, %cst [1] : vector<4x16x2048xf32> to vector<4x2048xf32>
    %c0_2 = arith.constant 0 : index
    %c0_3 = arith.constant 0 : index
    %2 = vector.load %arg2[%c0_2, %c0_3] : memref<2048x32xf32, #tpu.memory_space<vmem>>, vector<2048x32xf32>
    %cst_4 = arith.constant dense<0.000000e+00> : vector<4x32xf32>
    %3 = tpu.matmul %1, %2, %cst_4 {dimension_numbers = #tpu.dot_dimension_numbers<[1], [0], [0], [1], [0, 0, 1, 1], [], []>} : vector<4x2048xf32>, vector<2048x32xf32>, vector<4x32xf32> -> vector<4x32xf32>
    %c0_5 = arith.constant 0 : index
    %c0_6 = arith.constant 0 : index
    %4 = vector.load %arg3[%c0_5, %c0_6] : memref<3x32xf32, #tpu.memory_space<vmem>>, vector<3x32xf32>
    %5 = vector.extract_strided_slice %4 {offsets = [0, 0], sizes = [1, 32], strides = [1, 1]} : vector<3x32xf32> to vector<1x32xf32>
    %6 = vector.broadcast %5 : vector<1x32xf32> to vector<4x32xf32>
    %7 = arith.addf %3, %6 : vector<4x32xf32>
    %cst_7 = arith.constant dense<0.000000e+00> : vector<32xf32>
    %8 = vector.multi_reduction <add>, %7, %cst_7 [0] : vector<4x32xf32> to vector<32xf32>
    %9 = vector.shape_cast %8 : vector<32xf32> to vector<1x32xf32>
    %cst_8 = arith.constant 4.000000e+00 : f32
    %10 = vector.broadcast %cst_8 : f32 to vector<1x32xf32>
    %11 = arith.divf %9, %10 : vector<1x32xf32>
    %12 = vector.broadcast %11 : vector<1x32xf32> to vector<4x32xf32>
    %13 = arith.subf %7, %12 : vector<4x32xf32>
    %14 = arith.mulf %13, %13 : vector<4x32xf32>
    %cst_9 = arith.constant dense<0.000000e+00> : vector<32xf32>
    %15 = vector.multi_reduction <add>, %14, %cst_9 [0] : vector<4x32xf32> to vector<32xf32>
    %16 = vector.shape_cast %15 : vector<32xf32> to vector<1x32xf32>
    %cst_10 = arith.constant 4.000000e+00 : f32
    %17 = vector.broadcast %cst_10 : f32 to vector<1x32xf32>
    %18 = arith.divf %16, %17 : vector<1x32xf32>
    %cst_11 = arith.constant 9.99999974E-6 : f32
    %19 = vector.broadcast %cst_11 : f32 to vector<1x32xf32>
    %20 = arith.addf %18, %19 : vector<1x32xf32>
    %21 = math.rsqrt %20 : vector<1x32xf32>
    %22 = vector.broadcast %21 : vector<1x32xf32> to vector<4x32xf32>
    %23 = arith.mulf %13, %22 : vector<4x32xf32>
    %24 = vector.extract_strided_slice %4 {offsets = [1, 0], sizes = [1, 32], strides = [1, 1]} : vector<3x32xf32> to vector<1x32xf32>
    %25 = vector.broadcast %24 : vector<1x32xf32> to vector<4x32xf32>
    %26 = arith.mulf %23, %25 : vector<4x32xf32>
    %27 = vector.extract_strided_slice %4 {offsets = [2, 0], sizes = [1, 32], strides = [1, 1]} : vector<3x32xf32> to vector<1x32xf32>
    %28 = vector.broadcast %27 : vector<1x32xf32> to vector<4x32xf32>
    %29 = arith.addf %26, %28 : vector<4x32xf32>
    %c0_12 = arith.constant 0 : index
    %c0_13 = arith.constant 0 : index
    %30 = vector.load %arg4[%c0_12, %c0_13] : memref<4x32xf32, #tpu.memory_space<vmem>>, vector<4x32xf32>
    tpu.vector_store %arg4[%c0_12, %c0_13], %29 {strides = array<i32>} : memref<4x32xf32, #tpu.memory_space<vmem>>, vector<4x32xf32>,
    return
  }
  func.func @transform_0(%arg0: i32) -> (i32, i32, i32) {
    %c0_i32 = arith.constant 0 : i32
    %c0_i32_0 = arith.constant 0 : i32
    %c0_i32_1 = arith.constant 0 : i32
    %c0_i32_2 = arith.constant 0 : i32
    return %c0_i32, %c0_i32_0, %c0_i32_1 : i32, i32, i32
  }
  func.func @transform_1(%arg0: i32) -> (i32, i32) {
    %c0_i32 = arith.constant 0 : i32
    %c0_i32_0 = arith.constant 0 : i32
    %c0_i32_1 = arith.constant 0 : i32
    return %c0_i32, %c0_i32_0 : i32, i32
  }
  func.func @transform_2(%arg0: i32) -> (i32, i32) {
    %c0_i32 = arith.constant 0 : i32
    %c0_i32_0 = arith.constant 0 : i32
    %c0_i32_1 = arith.constant 0 : i32
    return %c0_i32, %c0_i32_0 : i32, i32
  }
  func.func @transform_3(%arg0: i32) -> (i32, i32) {
    %c0_i32 = arith.constant 0 : i32
    %c0_i32_0 = arith.constant 0 : i32
    %c0_i32_1 = arith.constant 0 : i32
    return %c0_i32, %c0_i32_0 : i32, i32
  }
}

</mosaic_0001>

<bundles_post_ra>
// kernel: tpu_custom_call.1
= control target key start
LH: loop header
LB: loop body
LE: loop exit
PB: predicated region body
PF: predicated region fallthrough
CT: control target
= control target key end

     0   :  { %vm913_vm0 = vcmask 1041409   ;;  %vm915_vm1 = vcmask 1042434   ;;  %vm917_vm2 = vcmask 1043459   ;;  %s2630_s0 = inlined_call_operand.vmem [shape: f32[4,16,2048], index: 0, kind: input, shape index: {}]   ;;  %s2631_s1 = inlined_call_operand.vmem [shape: f32[2048,32], index: 1, kind: input, shape index: {}]   ;;  %s2632_s2 = inlined_call_operand.vmem [shape: f32[3,32], index: 2, kind: input, shape index: {}]   ;;  %s2633_s3 = inlined_call_operand.hbm [shape: f32[4,32], index: 3, kind: output, shape index: {}]  }
   0x1   :  { %v606_v0 = vld [vmem:[%s2631_s1 + $0x78] sm:$0xff]  ;;  %v605_v2 = vld [vmem:[%s2631_s1 + $0x70] sm:$0xff]  ;;  %v604_v6 = vld [vmem:[%s2631_s1 + $0x68] sm:$0xff] }
   0x2   :  { %v638_v1 = vld [vmem:[%s2631_s1 + $0x178] sm:$0xff]  ;;  %980 = vmatpush.msra.mxu0 %v606_v0  ;;  %v637_v4 = vld [vmem:[%s2631_s1 + $0x170] sm:$0xff]  ;;  %v636_v8 = vld [vmem:[%s2631_s1 + $0x168] sm:$0xff] }
   0x3   :  { %1020 = vmatpush.msra.mxu2 %v638_v1  ;;  %v622_v3 = vld [vmem:[%s2631_s1 + $0xf8] sm:$0xff]  ;;  %v621_v7 = vld [vmem:[%s2631_s1 + $0xf0] sm:$0xff]  ;;  %v620_v10 = vld [vmem:[%s2631_s1 + $0xe8] sm:$0xff] }
   0x4   :  { %v654_v5 = vld [vmem:[%s2631_s1 + $0x1f8] sm:$0xff]  ;;  %1000 = vmatpush.msra.mxu1 %v622_v3  ;;  %981 = vmatpush.msra.mxu0 %v605_v2  ;;  %v653_v9 = vld [vmem:[%s2631_s1 + $0x1f0] sm:$0xff]  ;;  %v603_v11 = vld [vmem:[%s2631_s1 + $0x60] sm:$0xff] }
   0x5   :  { %1040 = vmatpush.msra.mxu3 %v654_v5  ;;  %1021 = vmatpush.msra.mxu2 %v637_v4  ;;  %v635_v12 = vld [vmem:[%s2631_s1 + $0x160] sm:$0xff]  ;;  %v652_v13 = vld [vmem:[%s2631_s1 + $0x1e8] sm:$0xff]  ;;  %v602_v16 = vld [vmem:[%s2631_s1 + $0x58] sm:$0xff] }
   0x6   :  { %1001 = vmatpush.msra.mxu1 %v621_v7  ;;  %982 = vmatpush.msra.mxu0 %v604_v6  ;;  %v619_v14 = vld [vmem:[%s2631_s1 + $0xe0] sm:$0xff]  ;;  %v634_v17 = vld [vmem:[%s2631_s1 + $0x158] sm:$0xff]  ;;  %v601_v20 = vld [vmem:[%s2631_s1 + $0x50] sm:$0xff] }
   0x7   :  { %1041 = vmatpush.msra.mxu3 %v653_v9  ;;  %1022 = vmatpush.msra.mxu2 %v636_v8  ;;  %v651_v15 = vld [vmem:[%s2631_s1 + $0x1e0] sm:$0xff]  ;;  %v618_v18 = vld [vmem:[%s2631_s1 + $0xd8] sm:$0xff]  ;;  %v633_v21 = vld [vmem:[%s2631_s1 + $0x150] sm:$0xff] }
   0x8   :  { %1002 = vmatpush.msra.mxu1 %v620_v10  ;;  %983 = vmatpush.msra.mxu0 %v603_v11  ;;  %v650_v19 = vld [vmem:[%s2631_s1 + $0x1d8] sm:$0xff]  ;;  %v617_v22 = vld [vmem:[%s2631_s1 + $0xd0] sm:$0xff]  ;;  %v600_v24 = vld [vmem:[%s2631_s1 + $0x48] sm:$0xff] }
   0x9   :  { %1042 = vmatpush.msra.mxu3 %v652_v13  ;;  %1023 = vmatpush.msra.mxu2 %v635_v12  ;;  %v649_v23 = vld [vmem:[%s2631_s1 + $0x1d0] sm:$0xff]  ;;  %v632_v25 = vld [vmem:[%s2631_s1 + $0x148] sm:$0xff]  ;;  %v599_v28 = vld [vmem:[%s2631_s1 + $0x40] sm:$0xff] }
   0xa   :  { %1003 = vmatpush.msra.mxu1 %v619_v14  ;;  %984 = vmatpush.msra.mxu0 %v602_v16  ;;  %v616_v26 = vld [vmem:[%s2631_s1 + $0xc8] sm:$0xff]  ;;  %v631_v29 = vld [vmem:[%s2631_s1 + $0x140] sm:$0xff]  ;;  %v598_v32 = vld [vmem:[%s2631_s1 + $0x38] sm:$0xff] }
   0xb   :  { %1043 = vmatpush.msra.mxu3 %v651_v15  ;;  %1024 = vmatpush.msra.mxu2 %v634_v17  ;;  %v648_v27 = vld [vmem:[%s2631_s1 + $0x1c8] sm:$0xff]  ;;  %v615_v30 = vld [vmem:[%s2631_s1 + $0xc0] sm:$0xff]  ;;  %v630_v33 = vld [vmem:[%s2631_s1 + $0x138] sm:$0xff] }
   0xc   :  { %1004 = vmatpush.msra.mxu1 %v618_v18  ;;  %985 = vmatpush.msra.mxu0 %v601_v20  ;;  %v647_v31 = vld [vmem:[%s2631_s1 + $0x1c0] sm:$0xff]  ;;  %v614_v34 = vld [vmem:[%s2631_s1 + $0xb8] sm:$0xff]  ;;  %v597_v36 = vld [vmem:[%s2631_s1 + $0x30] sm:$0xff] }
   0xd   :  { %1044 = vmatpush.msra.mxu3 %v650_v19  ;;  %1025 = vmatpush.msra.mxu2 %v633_v21  ;;  %v646_v35 = vld [vmem:[%s2631_s1 + $0x1b8] sm:$0xff]  ;;  %v629_v37 = vld [vmem:[%s2631_s1 + $0x130] sm:$0xff]  ;;  %v596_v40 = vld [vmem:[%s2631_s1 + $0x28] sm:$0xff] }
   0xe   :  { %1005 = vmatpush.msra.mxu1 %v617_v22  ;;  %986 = vmatpush.msra.mxu0 %v600_v24  ;;  %v613_v38 = vld [vmem:[%s2631_s1 + $0xb0] sm:$0xff]  ;;  %v628_v41 = vld [vmem:[%s2631_s1 + $0x128] sm:$0xff]  ;;  %v595_v44 = vld [vmem:[%s2631_s1 + $0x20] sm:$0xff] }
   0xf   :  { %1045 = vmatpush.msra.mxu3 %v649_v23  ;;  %1026 = vmatpush.msra.mxu2 %v632_v25  ;;  %v645_v39 = vld [vmem:[%s2631_s1 + $0x1b0] sm:$0xff]  ;;  %v612_v42 = vld [vmem:[%s2631_s1 + $0xa8] sm:$0xff]  ;;  %v627_v45 = vld [vmem:[%s2631_s1 + $0x120] sm:$0xff] }
  0x10   :  { %1006 = vmatpush.msra.mxu1 %v616_v26  ;;  %987 = vmatpush.msra.mxu0 %v599_v28  ;;  %v644_v43 = vld [vmem:[%s2631_s1 + $0x1a8] sm:$0xff]  ;;  %v611_v46 = vld [vmem:[%s2631_s1 + $0xa0] sm:$0xff]  ;;  %v594_v48 = vld [vmem:[%s2631_s1 + $0x18] sm:$0xff] }
  0x11   :  { %1046 = vmatpush.msra.mxu3 %v648_v27  ;;  %1027 = vmatpush.msra.mxu2 %v631_v29  ;;  %v643_v47 = vld [vmem:[%s2631_s1 + $0x1a0] sm:$0xff]  ;;  %v626_v49 = vld [vmem:[%s2631_s1 + $0x118] sm:$0xff]  ;;  %v593_v52 = vld [vmem:[%s2631_s1 + $0x10] sm:$0xff] }
  0x12   :  { %1007 = vmatpush.msra.mxu1 %v615_v30  ;;  %988 = vmatpush.msra.mxu0 %v598_v32  ;;  %v610_v50 = vld [vmem:[%s2631_s1 + $0x98] sm:$0xff]  ;;  %v625_v53 = vld [vmem:[%s2631_s1 + $0x110] sm:$0xff]  ;;  %v592_v56 = vld [vmem:[%s2631_s1 + $0x8] sm:$0xff] }
  0x13   :  { %1047 = vmatpush.msra.mxu3 %v647_v31  ;;  %1028 = vmatpush.msra.mxu2 %v630_v33  ;;  %v642_v51 = vld [vmem:[%s2631_s1 + $0x198] sm:$0xff]  ;;  %v609_v54 = vld [vmem:[%s2631_s1 + $0x90] sm:$0xff]  ;;  %v624_v57 = vld [vmem:[%s2631_s1 + $0x108] sm:$0xff] }
  0x14   :  { %1008 = vmatpush.msra.mxu1 %v614_v34  ;;  %989 = vmatpush.msra.mxu0 %v597_v36  ;;  %v641_v55 = vld [vmem:[%s2631_s1 + $0x190] sm:$0xff]  ;;  %v608_v58 = vld [vmem:[%s2631_s1 + $0x88] sm:$0xff]  ;;  %v591_v60 = vld [vmem:[%s2631_s1] sm:$0xff] }
  0x15   :  { %1048 = vmatpush.msra.mxu3 %v646_v35  ;;  %1029 = vmatpush.msra.mxu2 %v629_v37  ;;  %v640_v59 = vld [vmem:[%s2631_s1 + $0x188] sm:$0xff]  ;;  %v623_v61 = vld [vmem:[%s2631_s1 + $0x100] sm:$0xff]  ;;  %v670_v62 = vld [vmem:[%s2631_s1 + $0x278] sm:$0xff] }
  0x16   :  { %1009 = vmatpush.msra.mxu1 %v613_v38  ;;  %990 = vmatpush.msra.mxu0 %v596_v40  ;;  %v702_v63 = vld [vmem:[%s2631_s1 + $0x378] sm:$0xff]  ;;  %v607_v0 = vld [vmem:[%s2631_s1 + $0x80] sm:$0xff]  ;;  %v669_v2 = vld [vmem:[%s2631_s1 + $0x270] sm:$0xff] }
  0x17   :  { %1049 = vmatpush.msra.mxu3 %v645_v39  ;;  %1030 = vmatpush.msra.mxu2 %v628_v41  ;;  %v639_v1 = vld [vmem:[%s2631_s1 + $0x180] sm:$0xff]  ;;  %v686_v3 = vld [vmem:[%s2631_s1 + $0x2f8] sm:$0xff]  ;;  %v701_v4 = vld [vmem:[%s2631_s1 + $0x370] sm:$0xff] }
  0x18   :  { %1010 = vmatpush.msra.mxu1 %v612_v42  ;;  %991 = vmatpush.msra.mxu0 %v595_v44  ;;  %v718_v5 = vld [vmem:[%s2631_s1 + $0x3f8] sm:$0xff]  ;;  %v668_v6 = vld [vmem:[%s2631_s1 + $0x268] sm:$0xff]  ;;  %v685_v7 = vld [vmem:[%s2631_s1 + $0x2f0] sm:$0xff] }
  0x19   :  { %1050 = vmatpush.msra.mxu3 %v644_v43  ;;  %1031 = vmatpush.msra.mxu2 %v627_v45  ;;  %v700_v8 = vld [vmem:[%s2631_s1 + $0x368] sm:$0xff]  ;;  %v717_v9 = vld [vmem:[%s2631_s1 + $0x3f0] sm:$0xff]  ;;  %v667_v10 = vld [vmem:[%s2631_s1 + $0x260] sm:$0xff] }
  0x1a   :  { %1011 = vmatpush.msra.mxu1 %v611_v46  ;;  %992 = vmatpush.msra.mxu0 %v594_v48  ;;  %v684_v11 = vld [vmem:[%s2631_s1 + $0x2e8] sm:$0xff]  ;;  %v699_v12 = vld [vmem:[%s2631_s1 + $0x360] sm:$0xff]  ;;  %v666_v14 = vld [vmem:[%s2631_s1 + $0x258] sm:$0xff] }
  0x1b   :  { %1051 = vmatpush.msra.mxu3 %v643_v47  ;;  %1032 = vmatpush.msra.mxu2 %v626_v49  ;;  %v716_v13 = vld [vmem:[%s2631_s1 + $0x3e8] sm:$0xff]  ;;  %v683_v15 = vld [vmem:[%s2631_s1 + $0x2e0] sm:$0xff]  ;;  %v698_v16 = vld [vmem:[%s2631_s1 + $0x358] sm:$0xff] }
  0x1c   :  { %1012 = vmatpush.msra.mxu1 %v610_v50  ;;  %993 = vmatpush.msra.mxu0 %v593_v52  ;;  %v715_v17 = vld [vmem:[%s2631_s1 + $0x3e0] sm:$0xff]  ;;  %v665_v18 = vld [vmem:[%s2631_s1 + $0x250] sm:$0xff]  ;;  %v682_v19 = vld [vmem:[%s2631_s1 + $0x2d8] sm:$0xff] }
  0x1d   :  { %1052 = vmatpush.msra.mxu3 %v642_v51  ;;  %1033 = vmatpush.msra.mxu2 %v625_v53  ;;  %v697_v20 = vld [vmem:[%s2631_s1 + $0x350] sm:$0xff]  ;;  %v714_v21 = vld [vmem:[%s2631_s1 + $0x3d8] sm:$0xff]  ;;  %v664_v22 = vld [vmem:[%s2631_s1 + $0x248] sm:$0xff] }
  0x1e   :  { %1013 = vmatpush.msra.mxu1 %v609_v54  ;;  %994 = vmatpush.msra.mxu0 %v592_v56  ;;  %v681_v23 = vld [vmem:[%s2631_s1 + $0x2d0] sm:$0xff]  ;;  %v696_v24 = vld [vmem:[%s2631_s1 + $0x348] sm:$0xff]  ;;  %v663_v26 = vld [vmem:[%s2631_s1 + $0x240] sm:$0xff] }
  0x1f   :  { %1053 = vmatpush.msra.mxu3 %v641_v55  ;;  %1034 = vmatpush.msra.mxu2 %v624_v57  ;;  %v713_v25 = vld [vmem:[%s2631_s1 + $0x3d0] sm:$0xff]  ;;  %v680_v27 = vld [vmem:[%s2631_s1 + $0x2c8] sm:$0xff]  ;;  %v695_v28 = vld [vmem:[%s2631_s1 + $0x340] sm:$0xff] }
  0x20   :  { %1014 = vmatpush.msra.mxu1 %v608_v58  ;;  %995 = vmatpush.msra.mxu0 %v591_v60  ;;  %v712_v29 = vld [vmem:[%s2631_s1 + $0x3c8] sm:$0xff]  ;;  %v15_v30 = vld [vmem:[%s2630_s0] sm:$0xff]  ;;  %v662_v33 = vld [vmem:[%s2631_s1 + $0x238] sm:$0xff] }
  0x21   :  { %1054 = vmatpush.msra.mxu3 %v640_v59  ;;  %1035 = vmatpush.msra.mxu2 %v623_v61  ;;  %v31_v31 = vld [vmem:[%s2630_s0 + $0x80] sm:$0xff]  ;;  %v694_v39 = vld [vmem:[%s2631_s1 + $0x338] sm:$0xff]  ;;  %v17_v45 = vld [vmem:[%s2630_s0 + $0x10] sm:$0xff] }
  0x22   :  { %1060 = vmatpush.msrb.mxu0 %v670_v62  ;;  %1015 = vmatpush.msra.mxu1 %v607_v0  ;;  %v47_v32 = vld [vmem:[%s2630_s0 + $0x100] sm:$0xff]  ;;  %v143_v38 = vadd.f32 %v31_v31, %v15_v30  ;;  %v33_v48 = vld [vmem:[%s2630_s0 + $0x90] sm:$0xff]  ;;  %v678_v59 = vld [vmem:[%s2631_s1 + $0x2b8] sm:$0xff] }
  0x23   :  { %1100 = vmatpush.msrb.mxu2 %v702_v63  ;;  %1055 = vmatpush.msra.mxu3 %v639_v1  ;;  %v679_v34 = vld [vmem:[%s2631_s1 + $0x2c0] sm:$0xff]  ;;  %v49_v49 = vld [vmem:[%s2630_s0 + $0x110] sm:$0xff]  ;;  %v157_v56 = vadd.f32 %v33_v48, %v17_v45  ;;  %v710_v1 = vld [vmem:[%s2631_s1 + $0x3b8] sm:$0xff] }
  0x24   :  { %1061 = vmatpush.msrb.mxu0 %v669_v2  ;;  %1080 = vmatpush.msrb.mxu1 %v686_v3  ;;  %v63_v35 = vld [vmem:[%s2630_s0 + $0x180] sm:$0xff]  ;;  %v144_v46 = vrot.slane %v143_v38, 4  ;;  %v65_v50 = vld [vmem:[%s2630_s0 + $0x190] sm:$0xff]  ;;  %v32_v45 = vld [vmem:[%s2630_s0 + $0x88] sm:$0xff] }
  0x25   :  { %1101 = vmatpush.msrb.mxu2 %v701_v4  ;;  %1120 = vmatpush.msrb.mxu3 %v718_v5  ;;  %v79_v36 = vld [vmem:[%s2630_s0 + $0x200] sm:$0xff]  ;;  %v255_v43 = vadd.f32 %v63_v35, %v47_v32  ;;  %v81_v53 = vld [vmem:[%s2630_s0 + $0x210] sm:$0xff]  ;;  %v269_v57 = vadd.f32 %v65_v50, %v49_v49  ;;  %v158_v4 = vrot.slane %v157_v56, 4  ;;  %v690_v32 = vld [vmem:[%s2631_s1 + $0x318] sm:$0xff] }
  0x26   :  { %1062 = vmatpush.msrb.mxu0 %v668_v6  ;;  %1081 = vmatpush.msrb.mxu1 %v685_v7  ;;  %v95_v37 = vld [vmem:[%s2630_s0 + $0x280] sm:$0xff]  ;;  %v97_v54 = vld [vmem:[%s2630_s0 + $0x290] sm:$0xff]  ;;  %v145_v60 = vadd.f32 %v144_v46, %v143_v38  ;;  %v660_v6 = vld [vmem:[%s2631_s1 + $0x228] sm:$0xff] }
  0x27   :  { %1102 = vmatpush.msrb.mxu2 %v700_v8  ;;  %1121 = vmatpush.msrb.mxu3 %v717_v9  ;;  %v711_v40 = vld [vmem:[%s2631_s1 + $0x3c0] sm:$0xff]  ;;  %v367_v44 = vadd.f32 %v95_v37, %v79_v36  ;;  %v256_v51 = vrot.slane %v255_v43, 4  ;;  %v113_v55 = vld [vmem:[%s2630_s0 + $0x310] sm:$0xff]  ;;  %v381_v63 = vadd.f32 %v97_v54, %v81_v53  ;;  %v270_v5 = vrot.slane %v269_v57, 4  ;;  %v656_v48 = vld [vmem:[%s2631_s1 + $0x208] sm:$0xff] }
  0x28   :  { %1063 = vmatpush.msrb.mxu0 %v667_v10  ;;  %1082 = vmatpush.msrb.mxu1 %v684_v11  ;;  %v111_v41 = vld [vmem:[%s2630_s0 + $0x300] sm:$0xff]  ;;  %v661_v58 = vld [vmem:[%s2631_s1 + $0x230] sm:$0xff]  ;;  %v146_v8 = vrot.slane %v145_v60, 2  ;;  %v688_v54 = vld [vmem:[%s2631_s1 + $0x308] sm:$0xff] }
  0x29   :  { %1103 = vmatpush.msrb.mxu2 %v699_v12  ;;  %1122 = vmatpush.msrb.mxu3 %v716_v13  ;;  %v127_v42 = vld [vmem:[%s2630_s0 + $0x380] sm:$0xff]  ;;  %v368_v52 = vrot.slane %v367_v44, 4  ;;  %v129_v62 = vld [vmem:[%s2630_s0 + $0x390] sm:$0xff]  ;;  %v257_v2 = vadd.f32 %v256_v51, %v255_v43  ;;  %v382_v10 = vrot.slane %v381_v63, 4  ;;  %v692_v12 = vld [vmem:[%s2631_s1 + $0x328] sm:$0xff] }
  0x2a   :  { %1064 = vmatpush.msrb.mxu0 %v666_v14  ;;  %1083 = vmatpush.msrb.mxu1 %v683_v15  ;;  %v479_v47 = vadd.f32 %v127_v42, %v111_v41  ;;  %v693_v0 = vld [vmem:[%s2631_s1 + $0x330] sm:$0xff]  ;;  %v493_v11 = vadd.f32 %v129_v62, %v113_v55 }
  0x2b   :  { %1104 = vmatpush.msrb.mxu2 %v698_v16  ;;  %1123 = vmatpush.msrb.mxu3 %v715_v17  ;;  %v369_v3 = vadd.f32 %v368_v52, %v367_v44  ;;  %v677_v7 = vld [vmem:[%s2631_s1 + $0x2b0] sm:$0xff]  ;;  %v258_v14 = vrot.slane %v257_v2, 2  ;;  %v159_v16 = vadd.f32 %v158_v4, %v157_v56  ;;  %v271_v17 = vadd.f32 %v270_v5, %v269_v57  ;;  %v16_v44 = vld [vmem:[%s2630_s0 + $0x8] sm:$0xff]  ;;  %v687_v5 = vld [vmem:[%s2631_s1 + $0x300] sm:$0xff] }
  0x2c   :  { %1065 = vmatpush.msrb.mxu0 %v665_v18  ;;  %1084 = vmatpush.msrb.mxu1 %v682_v19  ;;  %v480_v61 = vrot.slane %v479_v47, 4  ;;  %v709_v13 = vld [vmem:[%s2631_s1 + $0x3b0] sm:$0xff]  ;;  %v659_v18 = vld [vmem:[%s2631_s1 + $0x220] sm:$0xff]  ;;  %v676_v19 = vld [vmem:[%s2631_s1 + $0x2a8] sm:$0xff]  ;;  %v150_v4 = vadd.f32 %v32_v45, %v16_v44 }
  0x2d   :  { %1105 = vmatpush.msrb.mxu2 %v697_v20  ;;  %1124 = vmatpush.msrb.mxu3 %v714_v21  ;;  %v370_v15 = vrot.slane %v369_v3, 2  ;;  %v691_v20 = vld [vmem:[%s2631_s1 + $0x320] sm:$0xff]  ;;  %v147_v21 = vadd.f32 %v146_v8, %v145_v60  ;;  %v160_v30 = vrot.slane %v159_v16, 2  ;;  %v272_v31 = vrot.slane %v271_v17, 2  ;;  %v689_v46 = vld [vmem:[%s2631_s1 + $0x310] sm:$0xff] }
  0x2e   :  { %1066 = vmatpush.msrb.mxu0 %v664_v22  ;;  %1085 = vmatpush.msrb.mxu1 %v681_v23  ;;  %v481_v9 = vadd.f32 %v480_v61, %v479_v47  ;;  %v383_v23 = vadd.f32 %v382_v10, %v381_v63  ;;  %v706_v47 = vld [vmem:[%s2631_s1 + $0x398] sm:$0xff]  ;;  %v673_v53 = vld [vmem:[%s2631_s1 + $0x290] sm:$0xff]  ;;  %v655_v60 = vld [vmem:[%s2631_s1 + $0x200] sm:$0xff] }
  0x2f   :  { %1106 = vmatpush.msrb.mxu2 %v696_v24  ;;  %1125 = vmatpush.msrb.mxu3 %v713_v25  ;;  %v494_v24 = vrot.slane %v493_v11, 4  ;;  %v708_v25 = vld [vmem:[%s2631_s1 + $0x3a8] sm:$0xff]  ;;  %v148_v35 = vrot.slane %v147_v21, 1  ;;  %v161_v42 = vadd.f32 %v160_v30, %v159_v16  ;;  %v273_v43 = vadd.f32 %v272_v31, %v271_v17  ;;  %v705_v55 = vld [vmem:[%s2631_s1 + $0x390] sm:$0xff]  ;;  %v18_v17 = vld [vmem:[%s2630_s0 + $0x18] sm:$0xff] }
  0x30   :  { %1067 = vmatpush.msrb.mxu0 %v663_v26  ;;  %1086 = vmatpush.msrb.mxu1 %v680_v27  ;;  %v482_v22 = vrot.slane %v481_v9, 2  ;;  %v658_v26 = vld [vmem:[%s2631_s1 + $0x218] sm:$0xff]  ;;  %v675_v27 = vld [vmem:[%s2631_s1 + $0x2a0] sm:$0xff]  ;;  %v384_v37 = vrot.slane %v383_v23, 2  ;;  %v672_v61 = vld [vmem:[%s2631_s1 + $0x288] sm:$0xff]  ;;  %v151_v16 = vrot.slane %v150_v4, 4 }
  0x31   :  { %1107 = vmatpush.msrb.mxu2 %v695_v28  ;;  %1126 = vmatpush.msrb.mxu3 %v712_v29  ;;  %v259_v28 = vadd.f32 %v258_v14, %v257_v2  ;;  %v371_v29 = vadd.f32 %v370_v15, %v369_v3  ;;  %v495_v38 = vadd.f32 %v494_v24, %v493_v11  ;;  %v64_v2 = vld [vmem:[%s2630_s0 + $0x188] sm:$0xff]  ;;  %v82_v24 = vld [vmem:[%s2630_s0 + $0x218] sm:$0xff] }
  0x32   :  { %1068 = vmatpush.msrb.mxu0 %v662_v33  ;;  %1087 = vmatpush.msrb.mxu1 %v679_v34  ;;  %v707_v33 = vld [vmem:[%s2631_s1 + $0x3a0] sm:$0xff]  ;;  %v657_v34 = vld [vmem:[%s2631_s1 + $0x210] sm:$0xff]  ;;  %v483_v36 = vadd.f32 %v482_v22, %v481_v9  ;;  %v149_v49 = vadd.f32 %v148_v35, %v147_v21  ;;  %v385_v51 = vadd.f32 %v384_v37, %v383_v23  ;;  %v80_v3 = vld [vmem:[%s2630_s0 + $0x208] sm:$0xff] }
  0x33   :  { %1108 = vmatpush.msrb.mxu2 %v694_v39  ;;  %1127 = vmatpush.msrb.mxu3 %v711_v40  ;;  %v674_v39 = vld [vmem:[%s2631_s1 + $0x298] sm:$0xff]  ;;  %v260_v40 = vrot.slane %v259_v28, 1  ;;  %v372_v41 = vrot.slane %v371_v29, 1  ;;  %v496_v52 = vrot.slane %v495_v38, 2  ;;  %v96_v10 = vld [vmem:[%s2630_s0 + $0x288] sm:$0xff] }
  0x34   :  { %1069 = vmatpush.msrb.mxu0 %v661_v58  ;;  %1088 = vmatpush.msrb.mxu1 %v678_v59  ;;  %v484_v50 = vrot.slane %v483_v36, 1  ;;  %v162_v58 = vrot.slane %v161_v42, 1  ;;  %v274_v59 = vrot.slane %v273_v43, 1  ;;  %v386_v63 = vrot.slane %v385_v51, 1  ;;  %v112_v11 = vld [vmem:[%s2630_s0 + $0x308] sm:$0xff]  ;;  %v66_v23 = vld [vmem:[%s2630_s0 + $0x198] sm:$0xff] }
  0x35   :  { %1109 = vmatpush.msrb.mxu2 %v693_v0  ;;  %1128 = vmatpush.msrb.mxu3 %v710_v1  ;;  %v261_v56 = vadd.f32 %v260_v40, %v259_v28  ;;  %v373_v57 = vadd.f32 %v372_v41, %v371_v29  ;;  %v497_v0 = vadd.f32 %v496_v52, %v495_v38  ;;  %v48_v1 = vld [vmem:[%s2630_s0 + $0x108] sm:$0xff]  ;;  %v734_v28 = vld [vmem:[%s2631_s1 + $0x478] sm:$0xff]  ;;  %v671_v38 = vld [vmem:[%s2631_s1 + $0x280] sm:$0xff] }
  0x36   :  { %1070 = vmatpush.msrb.mxu0 %v660_v6  ;;  %1089 = vmatpush.msrb.mxu1 %v677_v7  ;;  %v485_v62 = vadd.f32 %v484_v50, %v483_v36  ;;  %v704_v6 = vld [vmem:[%s2631_s1 + $0x388] sm:$0xff]  ;;  %v163_v8 = vadd.f32 %v162_v58, %v161_v42  ;;  %v275_v9 = vadd.f32 %v274_v59, %v273_v43  ;;  %v766_v30 = vld [vmem:[%s2631_s1 + $0x578] sm:$0xff] }
  0x37   :  { %1110 = vmatpush.msrb.mxu2 %v692_v12  ;;  %1129 = vmatpush.msrb.mxu3 %v709_v13  ;;  %v914_v7 = vsel %vm913_vm0, %v261_v56, %v149_v49  ;;  %v128_v12 = vld [vmem:[%s2630_s0 + $0x388] sm:$0xff]  ;;  %v387_v14 = vadd.f32 %v386_v63, %v385_v51  ;;  %v498_v15 = vrot.slane %v497_v0, 1  ;;  %v262_v22 = vadd.f32 %v64_v2, %v48_v1  ;;  %v130_v35 = vld [vmem:[%s2630_s0 + $0x398] sm:$0xff]  ;;  %v731_v63 = vld [vmem:[%s2631_s1 + $0x460] sm:$0xff] }
  0x38   :  { %1071 = vmatpush.msrb.mxu0 %v659_v18  ;;  %1090 = vmatpush.msrb.mxu1 %v676_v19  ;;  %v916_v13 = vsel %vm915_vm1, %v373_v57, %v914_v7  ;;  %v34_v18 = vld [vmem:[%s2630_s0 + $0x98] sm:$0xff]  ;;  %v922_v21 = vsel %vm913_vm0, %v275_v9, %v163_v8  ;;  %v152_v29 = vadd.f32 %v151_v16, %v150_v4  ;;  %v732_v57 = vld [vmem:[%s2631_s1 + $0x468] sm:$0xff]  ;;  %v763_v4 = vld [vmem:[%s2631_s1 + $0x560] sm:$0xff] }
  0x39   :  { %1111 = vmatpush.msrb.mxu2 %v691_v20  ;;  %1130 = vmatpush.msrb.mxu3 %v708_v25  ;;  %v50_v19 = vld [vmem:[%s2630_s0 + $0x118] sm:$0xff]  ;;  %v918_v20 = vsel %vm917_vm2, %v485_v62, %v916_v13  ;;  %v263_v31 = vrot.slane %v262_v22, 4  ;;  %v164_v36 = vadd.f32 %v34_v18, %v18_v17  ;;  %v764_v58 = vld [vmem:[%s2631_s1 + $0x568] sm:$0xff] }
  0x3a   :  { %1072 = vmatpush.msrb.mxu0 %v658_v26  ;;  %1091 = vmatpush.msrb.mxu1 %v675_v27  ;;  %v98_v25 = vld [vmem:[%s2630_s0 + $0x298] sm:$0xff]  ;;  %v499_v26 = vadd.f32 %v498_v15, %v497_v0  ;;  %v923_v27 = vsel %vm915_vm1, %v387_v14, %v922_v21  ;;  %v153_v40 = vrot.slane %v152_v29, 2  ;;  %v276_v41 = vadd.f32 %v66_v23, %v50_v19 }
  0x3b   :  { %1112 = vmatpush.msrb.mxu2 %v690_v32  ;;  %1131 = vmatpush.msrb.mxu3 %v707_v33  ;;  %v374_v32 = vadd.f32 %v96_v10, %v80_v3  ;;  %v486_v33 = vadd.f32 %v128_v12, %v112_v11  ;;  %v388_v42 = vadd.f32 %v98_v25, %v82_v24  ;;  %v730_v15 = vld [vmem:[%s2631_s1 + $0x458] sm:$0xff] }
  0x3c   :  { %1073 = vmatpush.msrb.mxu0 %v657_v34  ;;  %1092 = vmatpush.msrb.mxu1 %v674_v39  ;;  %v114_v34 = vld [vmem:[%s2630_s0 + $0x318] sm:$0xff]  ;;  %v924_v37 = vsel %vm917_vm2, %v499_v26, %v923_v27  ;;  %v703_v39 = vld [vmem:[%s2631_s1 + $0x380] sm:$0xff]  ;;  %v264_v43 = vadd.f32 %v263_v31, %v262_v22  ;;  %v154_v49 = vadd.f32 %v153_v40, %v152_v29  ;;  %v277_v50 = vrot.slane %v276_v41, 4 }
  0x3d   :  { %1113 = vmatpush.msrb.mxu2 %v689_v46  ;;  %1132 = vmatpush.msrb.mxu3 %v706_v47  ;;  %v375_v44 = vrot.slane %v374_v32, 4  ;;  %v487_v45 = vrot.slane %v486_v33, 4  ;;  %v165_v46 = vrot.slane %v164_v36, 4  ;;  %v733_v47 = vld [vmem:[%s2631_s1 + $0x470] sm:$0xff]  ;;  %v389_v51 = vrot.slane %v388_v42, 4  ;;  %v762_v16 = vld [vmem:[%s2631_s1 + $0x558] sm:$0xff] }
  0x3e   :  { %1074 = vmatpush.msrb.mxu0 %v656_v48  ;;  %1093 = vmatpush.msrb.mxu1 %v673_v53  ;;  %v765_v48 = vld [vmem:[%s2631_s1 + $0x570] sm:$0xff]  ;;  %v500_v52 = vadd.f32 %v130_v35, %v114_v34  ;;  %v265_v53 = vrot.slane %v264_v43, 2  ;;  %v155_v59 = vrot.slane %v154_v49, 1 }
  0x3f   :  { %1114 = vmatpush.msrb.mxu2 %v688_v54  ;;  %1133 = vmatpush.msrb.mxu3 %v705_v55  ;;  %v376_v54 = vadd.f32 %v375_v44, %v374_v32  ;;  %v488_v55 = vadd.f32 %v487_v45, %v486_v33  ;;  %v166_v56 = vadd.f32 %v165_v46, %v164_v36 }
  0x40   :  { %1075 = vmatpush.msrb.mxu0 %v655_v60  ;;  %1094 = vmatpush.msrb.mxu1 %v672_v61  ;;  %v278_v60 = vadd.f32 %v277_v50, %v276_v41  ;;  %v390_v61 = vadd.f32 %v389_v51, %v388_v42  ;;  %v501_v62 = vrot.slane %v500_v52, 4  ;;  %v266_v0 = vadd.f32 %v265_v53, %v264_v43 }
  0x41   :  { %1115 = vmatpush.msrb.mxu2 %v687_v5  ;;  %1134 = vmatpush.msrb.mxu3 %v704_v6  ;;  %v377_v1 = vrot.slane %v376_v54, 2  ;;  %v489_v2 = vrot.slane %v488_v55, 2  ;;  %v167_v3 = vrot.slane %v166_v56, 2  ;;  %v21_v5 = vld [vmem:[%s2630_s0 + $0x30] sm:$0xff]  ;;  %v156_v7 = vadd.f32 %v155_v59, %v154_v49 }
  0x42   :  { %996 = vmatmul.f32.vlgmr.msra.gmra.mxu0 %v918_v20  ;;  %1036 = vmatmul.f32.vlgmr.msra.gmra.mxu2 %v924_v37  ;;  %v37_v6 = vld [vmem:[%s2630_s0 + $0xb0] sm:$0xff]  ;;  %v279_v8 = vrot.slane %v278_v60, 2  ;;  %v391_v9 = vrot.slane %v390_v61, 2  ;;  %v502_v10 = vadd.f32 %v501_v62, %v500_v52  ;;  %v267_v11 = vrot.slane %v266_v0, 1 }
  0x43   :  { %1140 = vmatpush.msra.mxu0 %v734_v28  ;;  %1180 = vmatpush.msra.mxu2 %v766_v30  ;;  %v378_v12 = vadd.f32 %v377_v1, %v376_v54  ;;  %v490_v13 = vadd.f32 %v489_v2, %v488_v55  ;;  %v168_v14 = vadd.f32 %v167_v3, %v166_v56 }
  0x44   :  { %1095 = vmatpush.msrb.mxu1 %v671_v38  ;;  %1135 = vmatpush.msrb.mxu3 %v703_v39 }
  0x45   :  { %1141 = vmatpush.msra.mxu0 %v733_v47  ;;  %1181 = vmatpush.msra.mxu2 %v765_v48 }
  0x47   :  { %1142 = vmatpush.msra.mxu0 %v732_v57  ;;  %1182 = vmatpush.msra.mxu2 %v764_v58 }
  0x48   :  { %8 = vsyncpa [#allocation3], 0  ;;  %v280_v17 = vadd.f32 %v279_v8, %v278_v60  ;;  %v392_v18 = vadd.f32 %v391_v9, %v390_v61  ;;  %v503_v19 = vrot.slane %v502_v10, 2  ;;  %v185_v20 = vadd.f32 %v37_v6, %v21_v5  ;;  %v53_v25 = vld [vmem:[%s2630_s0 + $0x130] sm:$0xff]  ;;  %v750_v39 = vld [vmem:[%s2631_s1 + $0x4f8] sm:$0xff]  ;;  %s1350_s26 = sshll.u32 %s2633_s3, 4  ;;  %s1351_s26 = int_to_ptr.hbm [resolvable:$true] %s1350_s26 }
  0x49   :  { %1143 = vmatpush.msra.mxu0 %v731_v63  ;;  %1183 = vmatpush.msra.mxu2 %v763_v4  ;;  %v268_v21 = vadd.f32 %v267_v11, %v266_v0  ;;  %v379_v22 = vrot.slane %v378_v12, 1  ;;  %v491_v23 = vrot.slane %v490_v13, 1  ;;  %v169_v24 = vrot.slane %v168_v14, 1  ;;  %v69_v26 = vld [vmem:[%s2630_s0 + $0x1b0] sm:$0xff]  ;;  %v19_v44 = vld [vmem:[%s2630_s0 + $0x20] sm:$0xff]  ;;  %v782_v57 = vld [vmem:[%s2631_s1 + $0x5f8] sm:$0xff] }
  0x4a   :  { %v85_v27 = vld [vmem:[%s2630_s0 + $0x230] sm:$0xff]  ;;  %v281_v28 = vrot.slane %v280_v17, 1  ;;  %v393_v29 = vrot.slane %v392_v18, 1  ;;  %v504_v30 = vadd.f32 %v503_v19, %v502_v10  ;;  %v186_v34 = vrot.slane %v185_v20, 4  ;;  %v35_v51 = vld [vmem:[%s2630_s0 + $0xa0] sm:$0xff]  ;;  %v728_v8 = vld [vmem:[%s2631_s1 + $0x448] sm:$0xff] }
  0x4b   :  { %v101_v31 = vld [vmem:[%s2630_s0 + $0x2b0] sm:$0xff]  ;;  %1144 = vmatpush.msra.mxu0 %v730_v15  ;;  %1184 = vmatpush.msra.mxu2 %v762_v16  ;;  %v380_v35 = vadd.f32 %v379_v22, %v378_v12  ;;  %v492_v36 = vadd.f32 %v491_v23, %v490_v13  ;;  %v919_v37 = vsel %vm913_vm0, %v268_v21, %v156_v7  ;;  %v51_v52 = vld [vmem:[%s2630_s0 + $0x120] sm:$0xff]  ;;  %v760_v9 = vld [vmem:[%s2631_s1 + $0x548] sm:$0xff]  ;;  %vm1300_vm3 = vcmask 257024  }
  0x4c   :  { %v117_v32 = vld [vmem:[%s2630_s0 + $0x330] sm:$0xff]  ;;  %v170_v38 = vadd.f32 %v169_v24, %v168_v14  ;;  %v282_v40 = vadd.f32 %v281_v28, %v280_v17  ;;  %v394_v41 = vadd.f32 %v393_v29, %v392_v18  ;;  %v505_v42 = vrot.slane %v504_v30, 1  ;;  %v67_v53 = vld [vmem:[%s2630_s0 + $0x1a0] sm:$0xff]  ;;  %v748_v11 = vld [vmem:[%s2631_s1 + $0x4e8] sm:$0xff] }
  0x4d   :  { %v133_v33 = vld [vmem:[%s2630_s0 + $0x3b0] sm:$0xff]  ;;  %v187_v43 = vadd.f32 %v186_v34, %v185_v20  ;;  %v920_v47 = vsel %vm915_vm1, %v380_v35, %v919_v37  ;;  %v297_v48 = vadd.f32 %v69_v26, %v53_v25  ;;  %v409_v49 = vadd.f32 %v101_v31, %v85_v27  ;;  %v83_v59 = vld [vmem:[%s2630_s0 + $0x220] sm:$0xff]  ;;  %v780_v16 = vld [vmem:[%s2631_s1 + $0x5e8] sm:$0xff] }
  0x4e   :  { %v729_v45 = vld [vmem:[%s2631_s1 + $0x450] sm:$0xff]  ;;  %v521_v50 = vadd.f32 %v133_v33, %v117_v32  ;;  %v921_v54 = vsel %vm917_vm2, %v492_v36, %v920_v47  ;;  %v506_v55 = vadd.f32 %v505_v42, %v504_v30  ;;  %v925_v56 = vsel %vm913_vm0, %v282_v40, %v170_v38  ;;  %v99_v60 = vld [vmem:[%s2630_s0 + $0x2a0] sm:$0xff]  ;;  %v22_v27 = vld [vmem:[%s2630_s0 + $0x38] sm:$0xff] }
  0x4f   :  { %v761_v46 = vld [vmem:[%s2631_s1 + $0x550] sm:$0xff]  ;;  %1145 = vmatpush.msra.mxu0 %v729_v45  ;;  %v188_v58 = vrot.slane %v187_v43, 2  ;;  %1016 = vmatmul.f32.vlgmr.msra.gmra.mxu1 %v921_v54  ;;  %v926_v61 = vsel %vm915_vm1, %v394_v41, %v925_v56  ;;  %v298_v63 = vrot.slane %v297_v48, 4  ;;  %v410_v0 = vrot.slane %v409_v49, 4  ;;  %v115_v2 = vld [vmem:[%s2630_s0 + $0x320] sm:$0xff]  ;;  %v38_v28 = vld [vmem:[%s2630_s0 + $0xb8] sm:$0xff] }
  0x50   :  { %1185 = vmatpush.msra.mxu2 %v761_v46  ;;  %v749_v62 = vld [vmem:[%s2631_s1 + $0x4f0] sm:$0xff]  ;;  %v522_v1 = vrot.slane %v521_v50, 4  ;;  %v131_v3 = vld [vmem:[%s2630_s0 + $0x3a0] sm:$0xff]  ;;  %v927_v4 = vsel %vm917_vm2, %v506_v55, %v926_v61  ;;  %1160 = vmatpush.msra.mxu1 %v750_v39  ;;  %v171_v6 = vadd.f32 %v35_v51, %v19_v44  ;;  %v283_v7 = vadd.f32 %v67_v53, %v51_v52  ;;  %v726_v34 = vld [vmem:[%s2631_s1 + $0x438] sm:$0xff] }
  0x51   :  { %v189_v5 = vadd.f32 %v188_v58, %v187_v43  ;;  %1056 = vmatmul.f32.vlgmr.msra.gmra.mxu3 %v927_v4  ;;  %v781_v10 = vld [vmem:[%s2631_s1 + $0x5f0] sm:$0xff]  ;;  %v299_v12 = vadd.f32 %v298_v63, %v297_v48  ;;  %v411_v13 = vadd.f32 %v410_v0, %v409_v49  ;;  %v395_v15 = vadd.f32 %v99_v60, %v83_v59  ;;  %v747_v18 = vld [vmem:[%s2631_s1 + $0x4e0] sm:$0xff]  ;;  %v746_v40 = vld [vmem:[%s2631_s1 + $0x4d8] sm:$0xff] }
  0x52   :  { %v523_v14 = vadd.f32 %v522_v1, %v521_v50  ;;  %1200 = vmatpush.msra.mxu3 %v782_v57  ;;  %1161 = vmatpush.msra.mxu1 %v749_v62  ;;  %v172_v19 = vrot.slane %v171_v6, 4  ;;  %v284_v20 = vrot.slane %v283_v7, 4  ;;  %v507_v21 = vadd.f32 %v131_v3, %v115_v2  ;;  %v727_v22 = vld [vmem:[%s2631_s1 + $0x440] sm:$0xff]  ;;  %v54_v44 = vld [vmem:[%s2630_s0 + $0x138] sm:$0xff]  ;;  %v745_v54 = vld [vmem:[%s2631_s1 + $0x4d0] sm:$0xff] }
  0x53   :  { %v190_v17 = vrot.slane %v189_v5, 1  ;;  %v300_v23 = vrot.slane %v299_v12, 2  ;;  %v412_v24 = vrot.slane %v411_v13, 2  ;;  %v396_v26 = vrot.slane %v395_v15, 4  ;;  %1146 = vmatpush.msra.mxu0 %v728_v8  ;;  %1186 = vmatpush.msra.mxu2 %v760_v9  ;;  %v759_v33 = vld [vmem:[%s2631_s1 + $0x540] sm:$0xff]  ;;  %v70_v45 = vld [vmem:[%s2630_s0 + $0x1b8] sm:$0xff] }
  0x54   :  { %v524_v25 = vrot.slane %v523_v14, 2  ;;  %1201 = vmatpush.msra.mxu3 %v781_v10  ;;  %1162 = vmatpush.msra.mxu1 %v748_v11  ;;  %v173_v30 = vadd.f32 %v172_v19, %v171_v6  ;;  %v285_v31 = vadd.f32 %v284_v20, %v283_v7  ;;  %v508_v32 = vrot.slane %v507_v21, 4  ;;  %v779_v38 = vld [vmem:[%s2631_s1 + $0x5e0] sm:$0xff]  ;;  %v86_v46 = vld [vmem:[%s2630_s0 + $0x238] sm:$0xff]  ;;  %v725_v60 = vld [vmem:[%s2631_s1 + $0x430] sm:$0xff] }
  0x55   :  { %v191_v29 = vadd.f32 %v190_v17, %v189_v5  ;;  %v301_v35 = vadd.f32 %v300_v23, %v299_v12  ;;  %v413_v36 = vadd.f32 %v412_v24, %v411_v13  ;;  %v397_v39 = vadd.f32 %v396_v26, %v395_v15  ;;  %1147 = vmatpush.msra.mxu0 %v727_v22  ;;  %v758_v48 = vld [vmem:[%s2631_s1 + $0x538] sm:$0xff]  ;;  %v757_v61 = vld [vmem:[%s2631_s1 + $0x530] sm:$0xff]  ;;  %v744_v4 = vld [vmem:[%s2631_s1 + $0x4c8] sm:$0xff] }
  0x56   :  { %v525_v37 = vadd.f32 %v524_v25, %v523_v14  ;;  %1202 = vmatpush.msra.mxu3 %v780_v16  ;;  %1163 = vmatpush.msra.mxu1 %v747_v18  ;;  %v174_v41 = vrot.slane %v173_v30, 2  ;;  %v286_v42 = vrot.slane %v285_v31, 2  ;;  %v509_v43 = vadd.f32 %v508_v32, %v507_v21  ;;  %v778_v53 = vld [vmem:[%s2631_s1 + $0x5d8] sm:$0xff]  ;;  %v777_v3 = vld [vmem:[%s2631_s1 + $0x5d0] sm:$0xff]  ;;  %v724_v10 = vld [vmem:[%s2631_s1 + $0x428] sm:$0xff] }
  0x57   :  { %v192_v47 = vadd.f32 %v38_v28, %v22_v27  ;;  %v302_v49 = vrot.slane %v301_v35, 1  ;;  %v414_v50 = vrot.slane %v413_v36, 1  ;;  %v398_v52 = vrot.slane %v397_v39, 2  ;;  %1187 = vmatpush.msra.mxu2 %v759_v33  ;;  %1148 = vmatpush.msra.mxu0 %v726_v34  ;;  %v102_v58 = vld [vmem:[%s2630_s0 + $0x2b8] sm:$0xff]  ;;  %v756_v11 = vld [vmem:[%s2631_s1 + $0x528] sm:$0xff]  ;;  %v743_v25 = vld [vmem:[%s2631_s1 + $0x4c0] sm:$0xff] }
  0x58   :  { %v526_v51 = vrot.slane %v525_v37, 1  ;;  %1203 = vmatpush.msra.mxu3 %v779_v38  ;;  %v175_v55 = vadd.f32 %v174_v41, %v173_v30  ;;  %v287_v56 = vadd.f32 %v286_v42, %v285_v31  ;;  %v510_v57 = vrot.slane %v509_v43, 2  ;;  %1164 = vmatpush.msra.mxu1 %v746_v40  ;;  %v118_v2 = vld [vmem:[%s2630_s0 + $0x338] sm:$0xff]  ;;  %v20_v16 = vld [vmem:[%s2630_s0 + $0x28] sm:$0xff]  ;;  %v775_v31 = vld [vmem:[%s2631_s1 + $0x5c0] sm:$0xff] }
  0x59   :  { %v193_v59 = vrot.slane %v192_v47, 4  ;;  %v303_v62 = vadd.f32 %v302_v49, %v301_v35  ;;  %v415_v63 = vadd.f32 %v414_v50, %v413_v36  ;;  %v399_v1 = vadd.f32 %v398_v52, %v397_v39  ;;  %1188 = vmatpush.msra.mxu2 %v758_v48  ;;  %v134_v8 = vld [vmem:[%s2630_s0 + $0x3b8] sm:$0xff]  ;;  %v36_v17 = vld [vmem:[%s2630_s0 + $0xa8] sm:$0xff]  ;;  %1149 = vmatpush.msra.mxu0 %v725_v60  ;;  %v723_v32 = vld [vmem:[%s2631_s1 + $0x420] sm:$0xff] }
  0x5a   :  { %v527_v0 = vadd.f32 %v526_v51, %v525_v37  ;;  %v176_v5 = vrot.slane %v175_v55, 1  ;;  %v288_v6 = vrot.slane %v287_v56, 1  ;;  %v511_v7 = vadd.f32 %v510_v57, %v509_v43  ;;  %1204 = vmatpush.msra.mxu3 %v778_v53  ;;  %1165 = vmatpush.msra.mxu1 %v745_v54  ;;  %v776_v18 = vld [vmem:[%s2631_s1 + $0x5c8] sm:$0xff]  ;;  %v742_v39 = vld [vmem:[%s2631_s1 + $0x4b8] sm:$0xff]  ;;  %v741_v51 = vld [vmem:[%s2631_s1 + $0x4b0] sm:$0xff] }
  0x5b   :  { %v194_v9 = vadd.f32 %v193_v59, %v192_v47  ;;  %v934_v12 = vsel %vm913_vm0, %v303_v62, %v191_v29  ;;  %v400_v13 = vrot.slane %v399_v1, 1  ;;  %v304_v14 = vadd.f32 %v70_v45, %v54_v44  ;;  %1189 = vmatpush.msra.mxu2 %v757_v61  ;;  %v52_v23 = vld [vmem:[%s2630_s0 + $0x128] sm:$0xff]  ;;  %1150 = vmatpush.msra.mxu0 %v724_v10  ;;  %v774_v45 = vld [vmem:[%s2631_s1 + $0x5b8] sm:$0xff]  ;;  %v773_v57 = vld [vmem:[%s2631_s1 + $0x5b0] sm:$0xff] }
  0x5c   :  { %v416_v15 = vadd.f32 %v102_v58, %v86_v46  ;;  %v935_v19 = vsel %vm915_vm1, %v415_v63, %v934_v12  ;;  %v177_v20 = vadd.f32 %v176_v5, %v175_v55  ;;  %v289_v21 = vadd.f32 %v288_v6, %v287_v56  ;;  %v68_v24 = vld [vmem:[%s2630_s0 + $0x1a8] sm:$0xff]  ;;  %1205 = vmatpush.msra.mxu3 %v777_v3  ;;  %v755_v46 = vld [vmem:[%s2631_s1 + $0x520] sm:$0xff]  ;;  %v722_v52 = vld [vmem:[%s2631_s1 + $0x418] sm:$0xff] }
  0x5d   :  { %v512_v22 = vrot.slane %v511_v7, 1  ;;  %1166 = vmatpush.msra.mxu1 %v744_v4  ;;  %v936_v26 = vsel %vm917_vm2, %v527_v0, %v935_v19  ;;  %v401_v27 = vadd.f32 %v400_v13, %v399_v1  ;;  %v195_v28 = vrot.slane %v194_v9, 2  ;;  %v84_v30 = vld [vmem:[%s2630_s0 + $0x228] sm:$0xff]  ;;  %1190 = vmatpush.msra.mxu2 %v756_v11  ;;  %v754_v59 = vld [vmem:[%s2631_s1 + $0x518] sm:$0xff]  ;;  %v721_v0 = vld [vmem:[%s2631_s1 + $0x410] sm:$0xff] }
  0x5e   :  { %v305_v29 = vrot.slane %v304_v14, 4  ;;  %1116 = vmatmul.f32.vlgmr.msrb.gmra.mxu2 %v936_v26  ;;  %v928_v34 = vsel %vm913_vm0, %v289_v21, %v177_v20  ;;  %v417_v35 = vrot.slane %v416_v15, 4  ;;  %v528_v36 = vadd.f32 %v134_v8, %v118_v2  ;;  %v100_v37 = vld [vmem:[%s2630_s0 + $0x2a8] sm:$0xff]  ;;  %1206 = vmatpush.msra.mxu3 %v776_v18  ;;  %v23_v1 = vld [vmem:[%s2630_s0 + $0x40] sm:$0xff]  ;;  %v753_v8 = vld [vmem:[%s2631_s1 + $0x510] sm:$0xff] }
  0x5f   :  { %v513_v33 = vadd.f32 %v512_v22, %v511_v7  ;;  %v116_v38 = vld [vmem:[%s2630_s0 + $0x328] sm:$0xff]  ;;  %v929_v40 = vsel %vm915_vm1, %v401_v27, %v928_v34  ;;  %v196_v41 = vadd.f32 %v195_v28, %v194_v9  ;;  %v178_v44 = vadd.f32 %v36_v17, %v20_v16  ;;  %1167 = vmatpush.msra.mxu1 %v743_v25  ;;  %v39_v2 = vld [vmem:[%s2630_s0 + $0xc0] sm:$0xff]  ;;  %v738_v25 = vld [vmem:[%s2631_s1 + $0x498] sm:$0xff] }
  0x60   :  { %v306_v42 = vadd.f32 %v305_v29, %v304_v14  ;;  %v132_v43 = vld [vmem:[%s2630_s0 + $0x3a8] sm:$0xff]  ;;  %v418_v48 = vadd.f32 %v417_v35, %v416_v15  ;;  %v529_v49 = vrot.slane %v528_v36, 4  ;;  %v290_v50 = vadd.f32 %v68_v24, %v52_v23  ;;  %1207 = vmatpush.msra.mxu3 %v775_v31  ;;  %1151 = vmatpush.msra.mxu0 %v723_v32  ;;  %v739_v13 = vld [vmem:[%s2631_s1 + $0x4a0] sm:$0xff]  ;;  %v770_v26 = vld [vmem:[%s2631_s1 + $0x598] sm:$0xff] }
  0x61   :  { %v930_v47 = vsel %vm917_vm2, %v513_v33, %v929_v40  ;;  %v197_v53 = vrot.slane %v196_v41, 1  ;;  %v179_v55 = vrot.slane %v178_v44, 4  ;;  %v402_v56 = vadd.f32 %v100_v37, %v84_v30  ;;  %1168 = vmatpush.msra.mxu1 %v742_v39  ;;  %v740_v58 = vld [vmem:[%s2631_s1 + $0x4a8] sm:$0xff]  ;;  %1191 = vmatpush.msra.mxu2 %v755_v46  ;;  %v771_v18 = vld [vmem:[%s2631_s1 + $0x5a0] sm:$0xff]  ;;  %v737_v31 = vld [vmem:[%s2631_s1 + $0x490] sm:$0xff] }
  0x62   :  { %1076 = vmatmul.f32.vlgmr.msrb.gmra.mxu0 %v930_v47  ;;  %v307_v54 = vrot.slane %v306_v42, 2  ;;  %v419_v60 = vrot.slane %v418_v48, 2  ;;  %v530_v61 = vadd.f32 %v529_v49, %v528_v36  ;;  %v291_v62 = vrot.slane %v290_v50, 4  ;;  %1208 = vmatpush.msra.mxu3 %v774_v45  ;;  %v772_v7 = vld [vmem:[%s2631_s1 + $0x5a8] sm:$0xff]  ;;  %v719_v27 = vld [vmem:[%s2631_s1 + $0x400] sm:$0xff]  ;;  %v769_v32 = vld [vmem:[%s2631_s1 + $0x590] sm:$0xff] }
  0x63   :  { %v514_v63 = vadd.f32 %v132_v43, %v116_v38  ;;  %v198_v3 = vadd.f32 %v197_v53, %v196_v41  ;;  %v180_v5 = vadd.f32 %v179_v55, %v178_v44  ;;  %v403_v6 = vrot.slane %v402_v56, 4  ;;  %1169 = vmatpush.msra.mxu1 %v741_v51  ;;  %1152 = vmatpush.msra.mxu0 %v722_v52  ;;  %v720_v14 = vld [vmem:[%s2631_s1 + $0x408] sm:$0xff]  ;;  %v751_v33 = vld [vmem:[%s2631_s1 + $0x500] sm:$0xff]  ;;  %v798_v41 = vld [vmem:[%s2631_s1 + $0x678] sm:$0xff] }
  0x64   :  { %v308_v4 = vadd.f32 %v307_v54, %v306_v42  ;;  %v420_v9 = vadd.f32 %v419_v60, %v418_v48  ;;  %v531_v10 = vrot.slane %v530_v61, 2  ;;  %v292_v11 = vadd.f32 %v291_v62, %v290_v50  ;;  %1209 = vmatpush.msra.mxu3 %v773_v57  ;;  %1192 = vmatpush.msra.mxu2 %v754_v59  ;;  %v752_v19 = vld [vmem:[%s2631_s1 + $0x508] sm:$0xff]  ;;  %v55_v39 = vld [vmem:[%s2630_s0 + $0x140] sm:$0xff]  ;;  %v830_v48 = vld [vmem:[%s2631_s1 + $0x778] sm:$0xff] }
  0x65   :  { %v515_v12 = vrot.slane %v514_v63, 4  ;;  %v181_v16 = vrot.slane %v180_v5, 2  ;;  %v404_v17 = vadd.f32 %v403_v6, %v402_v56  ;;  %1170 = vmatpush.msra.mxu1 %v740_v58  ;;  %1153 = vmatpush.msra.mxu0 %v721_v0  ;;  %v199_v20 = vadd.f32 %v39_v2, %v23_v1  ;;  %v71_v40 = vld [vmem:[%s2630_s0 + $0x1c0] sm:$0xff]  ;;  %v736_v53 = vld [vmem:[%s2631_s1 + $0x488] sm:$0xff]  ;;  %v41_v62 = vld [vmem:[%s2630_s0 + $0xd0] sm:$0xff] }
  0x66   :  { %v309_v15 = vrot.slane %v308_v4, 1  ;;  %v421_v21 = vrot.slane %v420_v9, 1  ;;  %v532_v22 = vadd.f32 %v531_v10, %v530_v61  ;;  %v293_v23 = vrot.slane %v292_v11, 2  ;;  %1210 = vmatpush.msra.mxu3 %v772_v7  ;;  %1193 = vmatpush.msra.mxu2 %v753_v8  ;;  %v87_v45 = vld [vmem:[%s2630_s0 + $0x240] sm:$0xff]  ;;  %v768_v58 = vld [vmem:[%s2631_s1 + $0x588] sm:$0xff]  ;;  %v25_v61 = vld [vmem:[%s2630_s0 + $0x50] sm:$0xff] }
  0x67   :  { %v516_v24 = vadd.f32 %v515_v12, %v514_v63  ;;  %v182_v29 = vadd.f32 %v181_v16, %v180_v5  ;;  %v405_v30 = vrot.slane %v404_v17, 2  ;;  %1171 = vmatpush.msra.mxu1 %v739_v13  ;;  %1154 = vmatpush.msra.mxu0 %v720_v14  ;;  %v200_v34 = vrot.slane %v199_v20, 4  ;;  %v103_v46 = vld [vmem:[%s2630_s0 + $0x2c0] sm:$0xff]  ;;  %v57_v8 = vld [vmem:[%s2630_s0 + $0x150] sm:$0xff] }
  0x68   :  { %v310_v28 = vadd.f32 %v309_v15, %v308_v4  ;;  %v422_v35 = vadd.f32 %v421_v21, %v420_v9  ;;  %v533_v36 = vrot.slane %v532_v22, 1  ;;  %v294_v37 = vadd.f32 %v293_v23, %v292_v11  ;;  %1211 = vmatpush.msra.mxu3 %v771_v18  ;;  %1194 = vmatpush.msra.mxu2 %v752_v19  ;;  %v119_v54 = vld [vmem:[%s2630_s0 + $0x340] sm:$0xff]  ;;  %v73_v9 = vld [vmem:[%s2630_s0 + $0x1d0] sm:$0xff]  ;;  %v24_v23 = vld [vmem:[%s2630_s0 + $0x48] sm:$0xff] }
  0x69   :  { %v517_v38 = vrot.slane %v516_v24, 2  ;;  %v183_v43 = vrot.slane %v182_v29, 1  ;;  %v406_v44 = vadd.f32 %v405_v30, %v404_v17  ;;  %1172 = vmatpush.msra.mxu1 %v738_v25  ;;  %1155 = vmatpush.msra.mxu0 %v719_v27  ;;  %v201_v47 = vadd.f32 %v200_v34, %v199_v20  ;;  %v135_v55 = vld [vmem:[%s2630_s0 + $0x3c0] sm:$0xff]  ;;  %v89_v14 = vld [vmem:[%s2630_s0 + $0x250] sm:$0xff]  ;;  %v814_v30 = vld [vmem:[%s2631_s1 + $0x6f8] sm:$0xff] }
  0x6a   :  { %v937_v42 = vsel %vm913_vm0, %v310_v28, %v198_v3  ;;  %v534_v49 = vadd.f32 %v533_v36, %v532_v22  ;;  %v295_v51 = vrot.slane %v294_v37, 1  ;;  %1212 = vmatpush.msra.mxu3 %v770_v26  ;;  %1195 = vmatpush.msra.mxu2 %v751_v33  ;;  %v311_v60 = vadd.f32 %v71_v40, %v55_v39  ;;  %v735_v3 = vld [vmem:[%s2631_s1 + $0x480] sm:$0xff]  ;;  %v105_v15 = vld [vmem:[%s2630_s0 + $0x2d0] sm:$0xff]  ;;  %v846_v36 = vld [vmem:[%s2631_s1 + $0x7f8] sm:$0xff] }
  0x6b   :  { %v938_v50 = vsel %vm915_vm1, %v422_v35, %v937_v42  ;;  %v518_v52 = vadd.f32 %v517_v38, %v516_v24  ;;  %v184_v56 = vadd.f32 %v183_v43, %v182_v29  ;;  %v407_v57 = vrot.slane %v406_v44, 1  ;;  %1173 = vmatpush.msra.mxu1 %v737_v31  ;;  %1220 = vmatpush.msrb.mxu0 %v798_v41  ;;  %v767_v10 = vld [vmem:[%s2631_s1 + $0x580] sm:$0xff]  ;;  %v121_v16 = vld [vmem:[%s2630_s0 + $0x350] sm:$0xff]  ;;  %v40_v24 = vld [vmem:[%s2630_s0 + $0xc8] sm:$0xff] }
  0x6c   :  { %v202_v59 = vrot.slane %v201_v47, 2  ;;  %v939_v63 = vsel %vm917_vm2, %v534_v49, %v938_v50  ;;  %v296_v0 = vadd.f32 %v295_v51, %v294_v37  ;;  %1213 = vmatpush.msra.mxu3 %v769_v32  ;;  %v423_v2 = vadd.f32 %v103_v46, %v87_v45  ;;  %1260 = vmatpush.msrb.mxu2 %v830_v48  ;;  %v137_v22 = vld [vmem:[%s2630_s0 + $0x3d0] sm:$0xff]  ;;  %v796_v37 = vld [vmem:[%s2631_s1 + $0x668] sm:$0xff]  ;;  %v795_v45 = vld [vmem:[%s2631_s1 + $0x660] sm:$0xff] }
  0x6d   :  { %v519_v1 = vrot.slane %v518_v52, 1  ;;  %1136 = vmatmul.f32.vlgmr.msrb.gmra.mxu3 %v939_v63  ;;  %v408_v4 = vadd.f32 %v407_v57, %v406_v44  ;;  %1174 = vmatpush.msra.mxu1 %v736_v53  ;;  %v312_v6 = vrot.slane %v311_v60, 4  ;;  %v535_v7 = vadd.f32 %v135_v55, %v119_v54  ;;  %v797_v29 = vld [vmem:[%s2631_s1 + $0x670] sm:$0xff]  ;;  %v828_v43 = vld [vmem:[%s2631_s1 + $0x768] sm:$0xff]  ;;  %v827_v51 = vld [vmem:[%s2631_s1 + $0x760] sm:$0xff] }
  0x6e   :  { %v203_v5 = vadd.f32 %v202_v59, %v201_v47  ;;  %v931_v12 = vsel %vm913_vm0, %v296_v0, %v184_v56  ;;  %1214 = vmatpush.msra.mxu3 %v768_v58  ;;  %v424_v13 = vrot.slane %v423_v2, 4  ;;  %v213_v17 = vadd.f32 %v41_v62, %v25_v61  ;;  %v829_v31 = vld [vmem:[%s2631_s1 + $0x770] sm:$0xff]  ;;  %1221 = vmatpush.msrb.mxu0 %v797_v29  ;;  %v812_v50 = vld [vmem:[%s2631_s1 + $0x6e8] sm:$0xff]  ;;  %v794_v57 = vld [vmem:[%s2631_s1 + $0x658] sm:$0xff] }
  0x6f   :  { %v520_v11 = vadd.f32 %v519_v1, %v518_v52  ;;  %v932_v18 = vsel %vm915_vm1, %v408_v4, %v931_v12  ;;  %v313_v20 = vadd.f32 %v312_v6, %v311_v60  ;;  %v536_v21 = vrot.slane %v535_v7, 4  ;;  %1175 = vmatpush.msra.mxu1 %v735_v3  ;;  %v813_v38 = vld [vmem:[%s2631_s1 + $0x6f0] sm:$0xff]  ;;  %1261 = vmatpush.msrb.mxu2 %v829_v31  ;;  %v844_v56 = vld [vmem:[%s2631_s1 + $0x7e8] sm:$0xff]  ;;  %v811_v62 = vld [vmem:[%s2631_s1 + $0x6e0] sm:$0xff] }
  0x70   :  { %v204_v19 = vrot.slane %v203_v5, 1  ;;  %v425_v26 = vadd.f32 %v424_v13, %v423_v2  ;;  %v214_v27 = vrot.slane %v213_v17, 4  ;;  %v325_v28 = vadd.f32 %v73_v9, %v57_v8  ;;  %1215 = vmatpush.msra.mxu3 %v767_v10  ;;  %v845_v44 = vld [vmem:[%s2631_s1 + $0x7f0] sm:$0xff]  ;;  %1222 = vmatpush.msrb.mxu0 %v796_v37  ;;  %v826_v63 = vld [vmem:[%s2631_s1 + $0x758] sm:$0xff]  ;;  %v56_v4 = vld [vmem:[%s2630_s0 + $0x148] sm:$0xff] }
  0x71   :  { %v933_v25 = vsel %vm917_vm2, %v520_v11, %v932_v18  ;;  %v314_v33 = vrot.slane %v313_v20, 2  ;;  %v537_v34 = vadd.f32 %v536_v21, %v535_v7  ;;  %v437_v35 = vadd.f32 %v105_v15, %v89_v14  ;;  %1262 = vmatpush.msrb.mxu2 %v828_v43  ;;  %v843_v6 = vld [vmem:[%s2631_s1 + $0x7e0] sm:$0xff]  ;;  %v793_v7 = vld [vmem:[%s2631_s1 + $0x650] sm:$0xff]  ;;  %v88_v11 = vld [vmem:[%s2630_s0 + $0x248] sm:$0xff] }
  0x72   :  { %1096 = vmatmul.f32.vlgmr.msrb.gmra.mxu1 %v933_v25  ;;  %v2274_v32 = vadd.f32 %v204_v19, %v203_v5  ;;  %v426_v39 = vrot.slane %v425_v26, 2  ;;  %v215_v40 = vadd.f32 %v214_v27, %v213_v17  ;;  %v326_v41 = vrot.slane %v325_v28, 4  ;;  %1280 = vmatpush.msrb.mxu3 %v846_v36  ;;  %v72_v5 = vld [vmem:[%s2630_s0 + $0x1c8] sm:$0xff]  ;;  %v810_v14 = vld [vmem:[%s2631_s1 + $0x6d8] sm:$0xff]  ;;  %v825_v15 = vld [vmem:[%s2631_s1 + $0x750] sm:$0xff] }
  0x73   :  { %v549_v42 = vadd.f32 %v137_v22, %v121_v16  ;;  %1240 = vmatpush.msrb.mxu1 %v814_v30  ;;  %v315_v46 = vadd.f32 %v314_v33, %v313_v20  ;;  %v538_v47 = vrot.slane %v537_v34, 2  ;;  %v438_v48 = vrot.slane %v437_v35, 4  ;;  %1223 = vmatpush.msrb.mxu0 %v795_v45  ;;  %v104_v12 = vld [vmem:[%s2630_s0 + $0x2c8] sm:$0xff]  ;;  %v842_v21 = vld [vmem:[%s2631_s1 + $0x7d8] sm:$0xff]  ;;  %v809_v29 = vld [vmem:[%s2631_s1 + $0x6d0] sm:$0xff] }
  0x74   :  { %v206_v49 = vadd.f32 %v40_v24, %v24_v23  ;;  %v427_v52 = vadd.f32 %v426_v39, %v425_v26  ;;  %v216_v53 = vrot.slane %v215_v40, 2  ;;  %v327_v54 = vadd.f32 %v326_v41, %v325_v28  ;;  %1281 = vmatpush.msrb.mxu3 %v845_v44  ;;  %1263 = vmatpush.msrb.mxu2 %v827_v51  ;;  %v120_v20 = vld [vmem:[%s2630_s0 + $0x348] sm:$0xff]  ;;  %v26_v28 = vld [vmem:[%s2630_s0 + $0x58] sm:$0xff]  ;;  %v841_v36 = vld [vmem:[%s2631_s1 + $0x7d0] sm:$0xff] }
  0x75   :  { %v550_v55 = vrot.slane %v549_v42, 4  ;;  %1241 = vmatpush.msrb.mxu1 %v813_v38  ;;  %v316_v58 = vrot.slane %v315_v46, 1  ;;  %v539_v59 = vadd.f32 %v538_v47, %v537_v34  ;;  %v439_v60 = vadd.f32 %v438_v48, %v437_v35  ;;  %1224 = vmatpush.msrb.mxu0 %v794_v57  ;;  %v792_v22 = vld [vmem:[%s2631_s1 + $0x648] sm:$0xff]  ;;  %v42_v34 = vld [vmem:[%s2630_s0 + $0xd8] sm:$0xff] }
  0x76   :  { %v207_v61 = vrot.slane %v206_v49, 4  ;;  %v428_v0 = vrot.slane %v427_v52, 1  ;;  %v217_v1 = vadd.f32 %v216_v53, %v215_v40  ;;  %v328_v2 = vrot.slane %v327_v54, 2  ;;  %1282 = vmatpush.msrb.mxu3 %v844_v56  ;;  %1264 = vmatpush.msrb.mxu2 %v826_v63  ;;  %v136_v26 = vld [vmem:[%s2630_s0 + $0x3c8] sm:$0xff]  ;;  %v58_v41 = vld [vmem:[%s2630_s0 + $0x158] sm:$0xff] }
  0x77   :  { %v551_v3 = vadd.f32 %v550_v55, %v549_v42  ;;  %1242 = vmatpush.msrb.mxu1 %v812_v50  ;;  %v317_v8 = vadd.f32 %v316_v58, %v315_v46  ;;  %v540_v9 = vrot.slane %v539_v59, 1  ;;  %v440_v10 = vrot.slane %v439_v60, 2  ;;  %1225 = vmatpush.msrb.mxu0 %v793_v7  ;;  %v824_v35 = vld [vmem:[%s2631_s1 + $0x748] sm:$0xff]  ;;  %v791_v42 = vld [vmem:[%s2631_s1 + $0x640] sm:$0xff]  ;;  %v74_v48 = vld [vmem:[%s2630_s0 + $0x1d8] sm:$0xff] }
  0x78   :  { %v208_v13 = vadd.f32 %v207_v61, %v206_v49  ;;  %v429_v16 = vadd.f32 %v428_v0, %v427_v52  ;;  %v218_v17 = vrot.slane %v217_v1, 1  ;;  %v329_v18 = vadd.f32 %v328_v2, %v327_v54  ;;  %1283 = vmatpush.msrb.mxu3 %v843_v6  ;;  %1265 = vmatpush.msrb.mxu2 %v825_v15  ;;  %v808_v43 = vld [vmem:[%s2631_s1 + $0x6c8] sm:$0xff]  ;;  %v823_v49 = vld [vmem:[%s2631_s1 + $0x740] sm:$0xff]  ;;  %v90_v54 = vld [vmem:[%s2630_s0 + $0x258] sm:$0xff] }
  0x79   :  { %v552_v19 = vrot.slane %v551_v3, 2  ;;  %1243 = vmatpush.msrb.mxu1 %v811_v62  ;;  %v541_v23 = vadd.f32 %v540_v9, %v539_v59  ;;  %v940_v24 = vsel %vm913_vm0, %v317_v8, %v2274_v32  ;;  %v441_v25 = vadd.f32 %v440_v10, %v439_v60  ;;  %1226 = vmatpush.msrb.mxu0 %v792_v22  ;;  %v840_v50 = vld [vmem:[%s2631_s1 + $0x7c8] sm:$0xff]  ;;  %v106_v55 = vld [vmem:[%s2630_s0 + $0x2d8] sm:$0xff]  ;;  %v807_v0 = vld [vmem:[%s2631_s1 + $0x6c0] sm:$0xff] }
  0x7a   :  { %v209_v27 = vrot.slane %v208_v13, 2  ;;  %v941_v30 = vsel %vm915_vm1, %v429_v16, %v940_v24  ;;  %v219_v31 = vadd.f32 %v218_v17, %v217_v1  ;;  %v330_v32 = vrot.slane %v329_v18, 1  ;;  %1284 = vmatpush.msrb.mxu3 %v842_v21  ;;  %1266 = vmatpush.msrb.mxu2 %v824_v35  ;;  %v790_v57 = vld [vmem:[%s2631_s1 + $0x638] sm:$0xff]  ;;  %v789_v10 = vld [vmem:[%s2631_s1 + $0x630] sm:$0xff]  ;;  %v788_v22 = vld [vmem:[%s2631_s1 + $0x628] sm:$0xff] }
  0x7b   :  { %v553_v33 = vadd.f32 %v552_v19, %v551_v3  ;;  %1244 = vmatpush.msrb.mxu1 %v810_v14  ;;  %v942_v37 = vsel %vm917_vm2, %v541_v23, %v941_v30  ;;  %v442_v38 = vrot.slane %v441_v25, 1  ;;  %v318_v40 = vadd.f32 %v72_v5, %v56_v4  ;;  %v122_v62 = vld [vmem:[%s2630_s0 + $0x358] sm:$0xff]  ;;  %1227 = vmatpush.msrb.mxu0 %v791_v42  ;;  %v839_v5 = vld [vmem:[%s2631_s1 + $0x7c0] sm:$0xff]  ;;  %v821_v16 = vld [vmem:[%s2631_s1 + $0x730] sm:$0xff] }
  0x7c   :  { %v210_v39 = vadd.f32 %v209_v27, %v208_v13  ;;  %1156 = vmatmul.f32.vlgmr.msra.gmra.mxu0 %v942_v37  ;;  %v331_v44 = vadd.f32 %v330_v32, %v329_v18  ;;  %v430_v46 = vadd.f32 %v104_v12, %v88_v11  ;;  %v542_v47 = vadd.f32 %v136_v26, %v120_v20  ;;  %v138_v63 = vld [vmem:[%s2630_s0 + $0x3d8] sm:$0xff]  ;;  %v805_v23 = vld [vmem:[%s2631_s1 + $0x6b0] sm:$0xff]  ;;  %v787_v30 = vld [vmem:[%s2631_s1 + $0x620] sm:$0xff] }
  0x7d   :  { %v554_v45 = vrot.slane %v553_v33, 1  ;;  %1245 = vmatpush.msrb.mxu1 %v809_v29  ;;  %v443_v51 = vadd.f32 %v442_v38, %v441_v25  ;;  %v319_v53 = vrot.slane %v318_v40, 4  ;;  %v220_v56 = vadd.f32 %v42_v34, %v26_v28  ;;  %1285 = vmatpush.msrb.mxu3 %v841_v36  ;;  %v822_v4 = vld [vmem:[%s2631_s1 + $0x738] sm:$0xff]  ;;  %v820_v28 = vld [vmem:[%s2631_s1 + $0x728] sm:$0xff]  ;;  %v837_v29 = vld [vmem:[%s2631_s1 + $0x7b0] sm:$0xff] }
  0x7e   :  { %v211_v52 = vrot.slane %v210_v39, 1  ;;  %v946_v59 = vsel %vm913_vm0, %v331_v44, %v219_v31  ;;  %v431_v60 = vrot.slane %v430_v46, 4  ;;  %v543_v61 = vrot.slane %v542_v47, 4  ;;  %1267 = vmatpush.msrb.mxu2 %v823_v49  ;;  %1228 = vmatpush.msrb.mxu0 %v790_v57  ;;  %v806_v11 = vld [vmem:[%s2631_s1 + $0x6b8] sm:$0xff]  ;;  %v804_v34 = vld [vmem:[%s2631_s1 + $0x6a8] sm:$0xff]  ;;  %v27_v35 = vld [vmem:[%s2630_s0 + $0x60] sm:$0xff] }
  0x7f   :  { %v555_v58 = vadd.f32 %v554_v45, %v553_v33  ;;  %1246 = vmatpush.msrb.mxu1 %v808_v43  ;;  %v947_v1 = vsel %vm915_vm1, %v443_v51, %v946_v59  ;;  %v320_v2 = vadd.f32 %v319_v53, %v318_v40  ;;  %v221_v3 = vrot.slane %v220_v56, 4  ;;  %1286 = vmatpush.msrb.mxu3 %v840_v50  ;;  %v838_v17 = vld [vmem:[%s2631_s1 + $0x7b8] sm:$0xff]  ;;  %v43_v36 = vld [vmem:[%s2630_s0 + $0xe0] sm:$0xff]  ;;  %v836_v42 = vld [vmem:[%s2631_s1 + $0x7a8] sm:$0xff] }
  0x80   :  { %v432_v7 = vadd.f32 %v431_v60, %v430_v46  ;;  %v544_v8 = vadd.f32 %v543_v61, %v542_v47  ;;  %v332_v9 = vadd.f32 %v74_v48, %v58_v41  ;;  %v444_v14 = vadd.f32 %v106_v55, %v90_v54  ;;  %1268 = vmatpush.msrb.mxu2 %v822_v4  ;;  %v819_v41 = vld [vmem:[%s2631_s1 + $0x720] sm:$0xff]  ;;  %v786_v43 = vld [vmem:[%s2631_s1 + $0x618] sm:$0xff]  ;;  %v785_v55 = vld [vmem:[%s2631_s1 + $0x610] sm:$0xff] }
  0x81   :  { %v948_v6 = vsel %vm917_vm2, %v555_v58, %v947_v1  ;;  %v321_v12 = vrot.slane %v320_v2, 2  ;;  %v222_v13 = vadd.f32 %v221_v3, %v220_v56  ;;  %v556_v15 = vadd.f32 %v138_v63, %v122_v62  ;;  %1247 = vmatpush.msrb.mxu1 %v807_v0  ;;  %1287 = vmatpush.msrb.mxu3 %v839_v5  ;;  %v803_v47 = vld [vmem:[%s2631_s1 + $0x6a0] sm:$0xff]  ;;  %v818_v48 = vld [vmem:[%s2631_s1 + $0x718] sm:$0xff]  ;;  %v817_v5 = vld [vmem:[%s2631_s1 + $0x710] sm:$0xff] }
  0x82   :  { %1196 = vmatmul.f32.vlgmr.msra.gmra.mxu2 %v948_v6  ;;  %v212_v18 = vadd.f32 %v211_v52, %v210_v39  ;;  %v433_v19 = vrot.slane %v432_v7, 2  ;;  %v545_v20 = vrot.slane %v544_v8, 2  ;;  %v333_v21 = vrot.slane %v332_v9, 4  ;;  %1229 = vmatpush.msrb.mxu0 %v789_v10  ;;  %v835_v49 = vld [vmem:[%s2631_s1 + $0x7a0] sm:$0xff]  ;;  %v802_v61 = vld [vmem:[%s2631_s1 + $0x698] sm:$0xff] }
  0x83   :  { %v322_v24 = vadd.f32 %v321_v12, %v320_v2  ;;  %v223_v25 = vrot.slane %v222_v13, 2  ;;  %v445_v26 = vrot.slane %v444_v14, 4  ;;  %v557_v27 = vrot.slane %v556_v15, 4  ;;  %1248 = vmatpush.msrb.mxu1 %v806_v11  ;;  %1269 = vmatpush.msrb.mxu2 %v821_v16  ;;  %v59_v56 = vld [vmem:[%s2630_s0 + $0x160] sm:$0xff]  ;;  %v834_v10 = vld [vmem:[%s2631_s1 + $0x798] sm:$0xff] }
  0x84   :  { %v434_v31 = vadd.f32 %v433_v19, %v432_v7  ;;  %v546_v32 = vadd.f32 %v545_v20, %v544_v8  ;;  %v334_v33 = vadd.f32 %v333_v21, %v332_v9  ;;  %1288 = vmatpush.msrb.mxu3 %v838_v17  ;;  %1230 = vmatpush.msrb.mxu0 %v788_v22  ;;  %v75_v57 = vld [vmem:[%s2630_s0 + $0x1e0] sm:$0xff]  ;;  %v801_v19 = vld [vmem:[%s2631_s1 + $0x690] sm:$0xff]  ;;  %v816_v20 = vld [vmem:[%s2631_s1 + $0x708] sm:$0xff] }
  0x85   :  { %v323_v37 = vrot.slane %v322_v24, 1  ;;  %v224_v38 = vadd.f32 %v223_v25, %v222_v13  ;;  %v446_v39 = vadd.f32 %v445_v26, %v444_v14  ;;  %v558_v40 = vadd.f32 %v557_v27, %v556_v15  ;;  %1249 = vmatpush.msrb.mxu1 %v805_v23  ;;  %1270 = vmatpush.msrb.mxu2 %v820_v28  ;;  %v91_v62 = vld [vmem:[%s2630_s0 + $0x260] sm:$0xff]  ;;  %v29_v13 = vld [vmem:[%s2630_s0 + $0x70] sm:$0xff] }
  0x86   :  { %v435_v44 = vrot.slane %v434_v31, 1  ;;  %v547_v45 = vrot.slane %v546_v32, 1  ;;  %v335_v46 = vrot.slane %v334_v33, 2  ;;  %1289 = vmatpush.msrb.mxu3 %v837_v29  ;;  %v227_v50 = vadd.f32 %v43_v36, %v27_v35  ;;  %1231 = vmatpush.msrb.mxu0 %v787_v30  ;;  %v107_v63 = vld [vmem:[%s2630_s0 + $0x2e0] sm:$0xff]  ;;  %v45_v14 = vld [vmem:[%s2630_s0 + $0xf0] sm:$0xff]  ;;  %v800_v36 = vld [vmem:[%s2631_s1 + $0x688] sm:$0xff] }
  0x87   :  { %v324_v51 = vadd.f32 %v323_v37, %v322_v24  ;;  %v225_v52 = vrot.slane %v224_v38, 1  ;;  %v447_v53 = vrot.slane %v446_v39, 2  ;;  %v559_v54 = vrot.slane %v558_v40, 2  ;;  %1250 = vmatpush.msrb.mxu1 %v804_v34  ;;  %1271 = vmatpush.msrb.mxu2 %v819_v41  ;;  %v123_v6 = vld [vmem:[%s2630_s0 + $0x360] sm:$0xff]  ;;  %v833_v23 = vld [vmem:[%s2631_s1 + $0x790] sm:$0xff] }
  0x88   :  { %v436_v58 = vadd.f32 %v435_v44, %v434_v31  ;;  %v548_v59 = vadd.f32 %v547_v45, %v546_v32  ;;  %v336_v60 = vadd.f32 %v335_v46, %v334_v33  ;;  %1290 = vmatpush.msrb.mxu3 %v836_v42  ;;  %v228_v0 = vrot.slane %v227_v50, 4  ;;  %1232 = vmatpush.msrb.mxu0 %v786_v43  ;;  %v139_v7 = vld [vmem:[%s2630_s0 + $0x3e0] sm:$0xff]  ;;  %v61_v27 = vld [vmem:[%s2630_s0 + $0x170] sm:$0xff]  ;;  %v832_v43 = vld [vmem:[%s2631_s1 + $0x788] sm:$0xff] }
  0x89   :  { %v943_v1 = vsel %vm913_vm0, %v324_v51, %v212_v18  ;;  %v226_v2 = vadd.f32 %v225_v52, %v224_v38  ;;  %v448_v3 = vadd.f32 %v447_v53, %v446_v39  ;;  %v560_v4 = vadd.f32 %v559_v54, %v558_v40  ;;  %1251 = vmatpush.msrb.mxu1 %v803_v47  ;;  %v784_v18 = vld [vmem:[%s2631_s1 + $0x608] sm:$0xff]  ;;  %v77_v28 = vld [vmem:[%s2630_s0 + $0x1f0] sm:$0xff]  ;;  %v783_v31 = vld [vmem:[%s2631_s1 + $0x600] sm:$0xff] }
  0x8a   :  { %v944_v8 = vsel %vm915_vm1, %v436_v58, %v943_v1  ;;  %v337_v9 = vrot.slane %v336_v60, 1  ;;  %1272 = vmatpush.msrb.mxu2 %v818_v48  ;;  %v229_v11 = vadd.f32 %v228_v0, %v227_v50  ;;  %v339_v12 = vadd.f32 %v75_v57, %v59_v56  ;;  %1291 = vmatpush.msrb.mxu3 %v835_v49  ;;  %v815_v32 = vld [vmem:[%s2631_s1 + $0x700] sm:$0xff]  ;;  %v93_v40 = vld [vmem:[%s2630_s0 + $0x270] sm:$0xff] }
  0x8b   :  { %v945_v15 = vsel %vm917_vm2, %v548_v59, %v944_v8  ;;  %v449_v16 = vrot.slane %v448_v3, 1  ;;  %v561_v17 = vrot.slane %v560_v4, 1  ;;  %1233 = vmatpush.msrb.mxu0 %v785_v55  ;;  %v451_v21 = vadd.f32 %v107_v63, %v91_v62  ;;  %1252 = vmatpush.msrb.mxu1 %v802_v61  ;;  %v109_v41 = vld [vmem:[%s2630_s0 + $0x2f0] sm:$0xff]  ;;  %v799_v53 = vld [vmem:[%s2631_s1 + $0x680] sm:$0xff]  ;;  %v28_v59 = vld [vmem:[%s2630_s0 + $0x68] sm:$0xff] }
  0x8c   :  { %1176 = vmatmul.f32.vlgmr.msra.gmra.mxu1 %v945_v15  ;;  %v338_v22 = vadd.f32 %v337_v9, %v336_v60  ;;  %1273 = vmatpush.msrb.mxu2 %v817_v5  ;;  %v230_v24 = vrot.slane %v229_v11, 2  ;;  %v340_v25 = vrot.slane %v339_v12, 4  ;;  %v563_v26 = vadd.f32 %v139_v7, %v123_v6  ;;  %v125_v45 = vld [vmem:[%s2630_s0 + $0x370] sm:$0xff]  ;;  %v831_v58 = vld [vmem:[%s2631_s1 + $0x780] sm:$0xff]  ;;  %v44_v60 = vld [vmem:[%s2630_s0 + $0xe8] sm:$0xff] }
  0x8d   :  { %v450_v29 = vadd.f32 %v449_v16, %v448_v3  ;;  %v562_v30 = vadd.f32 %v561_v17, %v560_v4  ;;  %1292 = vmatpush.msrb.mxu3 %v834_v10  ;;  %v452_v33 = vrot.slane %v451_v21, 4  ;;  %v241_v34 = vadd.f32 %v45_v14, %v29_v13  ;;  %1234 = vmatpush.msrb.mxu0 %v784_v18  ;;  %v141_v46 = vld [vmem:[%s2630_s0 + $0x3f0] sm:$0xff] }
  0x8e   :  { %v949_v35 = vsel %vm913_vm0, %v338_v22, %v226_v2  ;;  %1274 = vmatpush.msrb.mxu2 %v816_v20  ;;  %v231_v37 = vadd.f32 %v230_v24, %v229_v11  ;;  %v341_v38 = vadd.f32 %v340_v25, %v339_v12  ;;  %v564_v39 = vrot.slane %v563_v26, 4  ;;  %1253 = vmatpush.msrb.mxu1 %v801_v19  ;;  %v76_v22 = vld [vmem:[%s2630_s0 + $0x1e8] sm:$0xff] }
  0x8f   :  { %v950_v42 = vsel %vm915_vm1, %v450_v29, %v949_v35  ;;  %1293 = vmatpush.msrb.mxu3 %v833_v23  ;;  %v453_v44 = vadd.f32 %v452_v33, %v451_v21  ;;  %v242_v47 = vrot.slane %v241_v34, 4  ;;  %v353_v48 = vadd.f32 %v77_v28, %v61_v27  ;;  %1235 = vmatpush.msrb.mxu0 %v783_v31  ;;  %v60_v21 = vld [vmem:[%s2630_s0 + $0x168] sm:$0xff]  ;;  %v30_v35 = vld [vmem:[%s2630_s0 + $0x78] sm:$0xff] }
  0x90   :  { %v951_v49 = vsel %vm917_vm2, %v562_v30, %v950_v42  ;;  %1275 = vmatpush.msrb.mxu2 %v815_v32  ;;  %v232_v50 = vrot.slane %v231_v37, 1  ;;  %v342_v51 = vrot.slane %v341_v38, 2  ;;  %v565_v52 = vadd.f32 %v564_v39, %v563_v26  ;;  %1254 = vmatpush.msrb.mxu1 %v800_v36  ;;  %v92_v23 = vld [vmem:[%s2630_s0 + $0x268] sm:$0xff]  ;;  %v46_v36 = vld [vmem:[%s2630_s0 + $0xf8] sm:$0xff] }
  0x91   :  { %1216 = vmatmul.f32.vlgmr.msra.gmra.mxu3 %v951_v49  ;;  %v454_v54 = vrot.slane %v453_v44, 2  ;;  %v243_v55 = vadd.f32 %v242_v47, %v241_v34  ;;  %v354_v56 = vrot.slane %v353_v48, 4  ;;  %v465_v57 = vadd.f32 %v109_v41, %v93_v40  ;;  %v108_v27 = vld [vmem:[%s2630_s0 + $0x2e8] sm:$0xff]  ;;  %v78_v49 = vld [vmem:[%s2630_s0 + $0x1f8] sm:$0xff] }
  0x92   :  { %1294 = vmatpush.msrb.mxu3 %v832_v43  ;;  %v233_v61 = vadd.f32 %v232_v50, %v231_v37  ;;  %v343_v62 = vadd.f32 %v342_v51, %v341_v38  ;;  %v566_v63 = vrot.slane %v565_v52, 2  ;;  %v577_v0 = vadd.f32 %v141_v46, %v125_v45  ;;  %1255 = vmatpush.msrb.mxu1 %v799_v53  ;;  %v124_v28 = vld [vmem:[%s2630_s0 + $0x368] sm:$0xff] }
  0x93   :  { %v455_v1 = vadd.f32 %v454_v54, %v453_v44  ;;  %v244_v2 = vrot.slane %v243_v55, 2  ;;  %v355_v3 = vadd.f32 %v354_v56, %v353_v48  ;;  %v466_v4 = vrot.slane %v465_v57, 4  ;;  %v140_v29 = vld [vmem:[%s2630_s0 + $0x3e8] sm:$0xff]  ;;  %v62_v48 = vld [vmem:[%s2630_s0 + $0x178] sm:$0xff] }
  0x94   :  { %v344_v5 = vrot.slane %v343_v62, 1  ;;  %v567_v6 = vadd.f32 %v566_v63, %v565_v52  ;;  %v578_v7 = vrot.slane %v577_v0, 4  ;;  %1295 = vmatpush.msrb.mxu3 %v831_v58  ;;  %v234_v8 = vadd.f32 %v44_v60, %v28_v59  ;;  %v110_v58 = vld [vmem:[%s2630_s0 + $0x2f8] sm:$0xff] }
  0x95   :  { %v456_v9 = vrot.slane %v455_v1, 1  ;;  %v245_v10 = vadd.f32 %v244_v2, %v243_v55  ;;  %v356_v11 = vrot.slane %v355_v3, 2  ;;  %v467_v12 = vadd.f32 %v466_v4, %v465_v57  ;;  %v94_v57 = vld [vmem:[%s2630_s0 + $0x278] sm:$0xff] }
  0x96   :  { %v345_v13 = vadd.f32 %v344_v5, %v343_v62  ;;  %v568_v14 = vrot.slane %v567_v6, 1  ;;  %v579_v15 = vadd.f32 %v578_v7, %v577_v0  ;;  %v235_v16 = vrot.slane %v234_v8, 4  ;;  %v126_v63 = vld [vmem:[%s2630_s0 + $0x378] sm:$0xff] }
  0x97   :  { %v457_v17 = vadd.f32 %v456_v9, %v455_v1  ;;  %v246_v18 = vrot.slane %v245_v10, 1  ;;  %v357_v19 = vadd.f32 %v356_v11, %v355_v3  ;;  %v468_v20 = vrot.slane %v467_v12, 2  ;;  %v142_v0 = vld [vmem:[%s2630_s0 + $0x3f8] sm:$0xff] }
  0x98   :  { %v569_v24 = vadd.f32 %v568_v14, %v567_v6  ;;  %v952_v25 = vsel %vm913_vm0, %v345_v13, %v233_v61  ;;  %v580_v26 = vrot.slane %v579_v15, 2  ;;  %v236_v30 = vadd.f32 %v235_v16, %v234_v8 }
  0x99   :  { %v953_v31 = vsel %vm915_vm1, %v457_v17, %v952_v25  ;;  %v247_v32 = vadd.f32 %v246_v18, %v245_v10  ;;  %v358_v33 = vrot.slane %v357_v19, 1  ;;  %v469_v34 = vadd.f32 %v468_v20, %v467_v12 }
  0x9a   :  { %v954_v37 = vsel %vm917_vm2, %v569_v24, %v953_v31  ;;  %v581_v38 = vadd.f32 %v580_v26, %v579_v15  ;;  %v237_v39 = vrot.slane %v236_v30, 2  ;;  %v346_v40 = vadd.f32 %v76_v22, %v60_v21 }
  0x9b   :  { %1236 = vmatmul.f32.vlgmr.msrb.gmra.mxu0 %v954_v37  ;;  %v359_v41 = vadd.f32 %v358_v33, %v357_v19  ;;  %v470_v42 = vrot.slane %v469_v34, 1  ;;  %v458_v43 = vadd.f32 %v108_v27, %v92_v23  ;;  %v570_v44 = vadd.f32 %v140_v29, %v124_v28 }
  0x9c   :  { %v582_v45 = vrot.slane %v581_v38, 1  ;;  %v238_v46 = vadd.f32 %v237_v39, %v236_v30  ;;  %v347_v47 = vrot.slane %v346_v40, 4  ;;  %v248_v50 = vadd.f32 %v46_v36, %v30_v35 }
  0x9d   :  { %v471_v51 = vadd.f32 %v470_v42, %v469_v34  ;;  %v958_v52 = vsel %vm913_vm0, %v359_v41, %v247_v32  ;;  %v459_v53 = vrot.slane %v458_v43, 4  ;;  %v571_v54 = vrot.slane %v570_v44, 4 }
  0x9e   :  { %v583_v55 = vadd.f32 %v582_v45, %v581_v38  ;;  %v348_v56 = vadd.f32 %v347_v47, %v346_v40  ;;  %v249_v59 = vrot.slane %v248_v50, 4  ;;  %v360_v1 = vadd.f32 %v78_v49, %v62_v48  ;;  %v2619_v48 = vld [vmem:[%s2632_s2] sm:$0x7]  ;;  %s1392_s2 = smov [#allocation2]  }
  0x9f   :  { %v959_v60 = vsel %vm915_vm1, %v471_v51, %v958_v52  ;;  %v460_v61 = vadd.f32 %v459_v53, %v458_v43  ;;  %v572_v62 = vadd.f32 %v571_v54, %v570_v44  ;;  %v239_v3 = vrot.slane %v238_v46, 1  ;;  %s1348_s23 = sshll.u32 %s1392_s2, 4  ;;  %s1349_s23 = int_to_ptr.vmem [resolvable:$true] %s1348_s23 }
  0xa0   :  { %v960_v2 = vsel %vm917_vm2, %v583_v55, %v959_v60  ;;  %v349_v4 = vrot.slane %v348_v56, 2  ;;  %v250_v5 = vadd.f32 %v249_v59, %v248_v50  ;;  %v361_v8 = vrot.slane %v360_v1, 4 }
  0xa1   :  { %1276 = vmatmul.f32.vlgmr.msrb.gmra.mxu2 %v960_v2  ;;  %v461_v6 = vrot.slane %v460_v61, 2  ;;  %v573_v7 = vrot.slane %v572_v62, 2  ;;  %v472_v9 = vadd.f32 %v110_v58, %v94_v57  ;;  %v584_v12 = vadd.f32 %v142_v0, %v126_v63 }
  0xa2   :  { %v350_v10 = vadd.f32 %v349_v4, %v348_v56  ;;  %v251_v11 = vrot.slane %v250_v5, 2  ;;  %v362_v15 = vadd.f32 %v361_v8, %v360_v1  ;;  %v240_v17 = vadd.f32 %v239_v3, %v238_v46 }
  0xa3   :  { %v462_v13 = vadd.f32 %v461_v6, %v460_v61  ;;  %v574_v14 = vadd.f32 %v573_v7, %v572_v62  ;;  %v473_v16 = vrot.slane %v472_v9, 4  ;;  %v585_v20 = vrot.slane %v584_v12, 4 }
  0xa4   :  { %v351_v18 = vrot.slane %v350_v10, 1  ;;  %v252_v19 = vadd.f32 %v251_v11, %v250_v5  ;;  %v363_v23 = vrot.slane %v362_v15, 2  ;;  %v848_v49 = vperm.slane %v2619_v48, 0 }
  0xa5   :  { %v463_v21 = vrot.slane %v462_v13, 1  ;;  %v575_v22 = vrot.slane %v574_v14, 1  ;;  %v474_v24 = vadd.f32 %v473_v16, %v472_v9  ;;  %v586_v27 = vadd.f32 %v585_v20, %v584_v12 }
  0xa6   :  { %v352_v25 = vadd.f32 %v351_v18, %v350_v10  ;;  %v253_v26 = vrot.slane %v252_v19, 1  ;;  %v364_v30 = vadd.f32 %v363_v23, %v362_v15  ;;  %v1391_v10 = vmov 4.0  }
  0xa7   :  { %v464_v28 = vadd.f32 %v463_v21, %v462_v13  ;;  %v576_v29 = vadd.f32 %v575_v22, %v574_v14  ;;  %v475_v31 = vrot.slane %v474_v24, 2  ;;  %v587_v33 = vrot.slane %v586_v27, 2 }
  0xa8   :  { %v955_v32 = vsel %vm913_vm0, %v352_v25, %v240_v17  ;;  %v254_v35 = vadd.f32 %v253_v26, %v252_v19  ;;  %v365_v36 = vrot.slane %v364_v30, 1  ;;  %1361 = vrcp.f32 %v1391_v10 }
  0xa9   :  { %v956_v34 = vsel %vm915_vm1, %v464_v28, %v955_v32  ;;  %v476_v37 = vadd.f32 %v475_v31, %v474_v24  ;;  %v588_v39 = vadd.f32 %v587_v33, %v586_v27 }
  0xaa   :  { %v957_v38 = vsel %vm917_vm2, %v576_v29, %v956_v34  ;;  %v366_v40 = vadd.f32 %v365_v36, %v364_v30 }
  0xab   :  { %1256 = vmatmul.f32.vlgmr.msrb.gmra.mxu1 %v957_v38  ;;  %v477_v41 = vrot.slane %v476_v37, 1  ;;  %v589_v42 = vrot.slane %v588_v39, 1 }
  0xac   :  { %v961_v44 = vsel %vm913_vm0, %v366_v40, %v254_v35 }
  0xad   :  { %v478_v43 = vadd.f32 %v477_v41, %v476_v37  ;;  %v590_v45 = vadd.f32 %v589_v42, %v588_v39 }
  0xae   :  { %v1362_v14 = vpop.eup %1361 }
  0xaf   :  { %v962_v46 = vsel %vm915_vm1, %v478_v43, %v961_v44  ;;  %v1309_v18 = vmul.f32 4.0, %v1362_v14  ;;  %vm1313_vm4 = vweird.f32 %v1362_v14 }
  0xb0   :  { %v963_v47 = vsel %vm917_vm2, %v590_v45, %v962_v46 }
  0xb1   :  { %1296 = vmatmul.f32.vlgmr.msrb.gmra.mxu3 %v963_v47  ;;  %v1310_v21 = vsub.f32 1.0, %v1309_v18 }
  0xb3   :  { %v1311_v24 = vmul.f32 %v1362_v14, %v1310_v21 }
  0xb5   :  { %v1312_v27 = vadd.f32 %v1362_v14, %v1311_v24 }
  0xb7   :  { %v1314_v30 = vsel %vm1313_vm4, %v1362_v14, %v1312_v27 }
  0xbf   :  { %v997_v50 = vpop.f32.mrf.mxu0 }
  0xc0   :  { %v998_v51 = vadd.f32 %v997_v50, %v848_v49 }
  0xc5   :  { %v1037_v54 = vpop.f32.mrf.mxu2 }
  0xcc   :  { %v1017_v52 = vpop.f32.mrf.mxu1 }
  0xcd   :  { %v1018_v53 = vadd.f32 %v1017_v52, %v998_v51  ;;  %v1338_v51 = vperm.slane %v2619_v48, 1 }
  0xcf   :  { %v1038_v55 = vadd.f32 %v1037_v54, %v1018_v53  ;;  %v1340_v53 = vperm.slane %v2619_v48, 2 }
  0xd4   :  { %v1057_v56 = vpop.f32.mrf.mxu3 }
  0xd5   :  { %v1058_v57 = vadd.f32 %v1057_v56, %v1038_v55 }
  0xdf   :  { %v1077_v58 = vpop.f32.mrf.mxu0 }
  0xe0   :  { %v1078_v59 = vadd.f32 %v1077_v58, %v1058_v57 }
  0xe1   :  { %v1117_v62 = vpop.f32.mrf.mxu2 }
  0xef   :  { %v1097_v60 = vpop.f32.mrf.mxu1 }
  0xf0   :  { %v1098_v61 = vadd.f32 %v1097_v60, %v1078_v59  ;;  %v1137_v0 = vpop.f32.mrf.mxu3 }
  0xf2   :  { %v1118_v63 = vadd.f32 %v1117_v62, %v1098_v61 }
  0xf4   :  { %v1138_v2 = vadd.f32 %v1137_v0, %v1118_v63 }
  0xf9   :  { %v1157_v1 = vpop.f32.mrf.mxu0 }
  0xfa   :  { %v1158_v3 = vadd.f32 %v1157_v1, %v1138_v2 }
 0x105   :  { %v1197_v5 = vpop.f32.mrf.mxu2 }
 0x109   :  { %v1177_v4 = vpop.f32.mrf.mxu1 }
 0x10a   :  { %v1178_v6 = vadd.f32 %v1177_v4, %v1158_v3 }
 0x10c   :  { %v1198_v7 = vadd.f32 %v1197_v5, %v1178_v6 }
 0x114   :  { %v1217_v8 = vpop.f32.mrf.mxu3 }
 0x115   :  { %v1218_v11 = vadd.f32 %v1217_v8, %v1198_v7 }
 0x118   :  { %v1237_v9 = vpop.f32.mrf.mxu0 }
 0x119   :  { %v1238_v12 = vadd.f32 %v1237_v9, %v1218_v11 }
 0x124   :  { %v1277_v15 = vpop.f32.mrf.mxu2 }
 0x128   :  { %v1257_v13 = vpop.f32.mrf.mxu1 }
 0x129   :  { %v1258_v16 = vadd.f32 %v1257_v13, %v1238_v12 }
 0x12b   :  { %v1278_v17 = vadd.f32 %v1277_v15, %v1258_v16 }
 0x134   :  { %v1297_v19 = vpop.f32.mrf.mxu3 }
 0x135   :  { %v1298_v20 = vadd.f32 %v1297_v19, %v1278_v17 }
 0x137   :  { %v1301_v22 = vsel %vm1300_vm3, %v1298_v20, 0.0 }
 0x138   :  { %v1302_v23 = vrot.slane %v1301_v22, 4 }
 0x13a   :  { %v1303_v25 = vadd.f32 %v1302_v23, %v1301_v22 }
 0x13c   :  { %v1304_v26 = vrot.slane %v1303_v25, 2 }
 0x13e   :  { %v1305_v28 = vadd.f32 %v1304_v26, %v1303_v25 }
 0x140   :  { %v1306_v29 = vrot.slane %v1305_v28, 1 }
 0x142   :  { %v1307_v31 = vadd.f32 %v1306_v29, %v1305_v28 }
 0x144   :  { %v1315_v32 = vmul.f32 %v1314_v30, %v1307_v31 }
 0x146   :  { %v1316_v33 = vsub.f32 %v1298_v20, %v1315_v32 }
 0x148   :  { %v1317_v34 = vmul.f32 %v1316_v33, %v1316_v33 }
 0x14a   :  { %v1318_v35 = vsel %vm1300_vm3, %v1317_v34, 0.0 }
 0x14b   :  { %v1319_v36 = vrot.slane %v1318_v35, 4 }
 0x14d   :  { %v1320_v37 = vadd.f32 %v1319_v36, %v1318_v35 }
 0x14f   :  { %v1321_v38 = vrot.slane %v1320_v37, 2 }
 0x151   :  { %v1322_v39 = vadd.f32 %v1321_v38, %v1320_v37 }
 0x153   :  { %v1323_v40 = vrot.slane %v1322_v39, 1 }
 0x155   :  { %v1324_v41 = vadd.f32 %v1323_v40, %v1322_v39 }
 0x157   :  { %v1325_v42 = vmul.f32 %v1324_v41, %v1314_v30 }
 0x159   :  { %v1326_v43 = vadd.f32 1e-05, %v1325_v42 }
 0x15b   :  { %1363 = vrsqrt.f32 %v1326_v43  ;;  %vm1333_vm6 = vweird.f32 %v1326_v43 }
 0x161   :  { %v1364_v44 = vpop.eup %1363 }
 0x162   :  { %v1328_v45 = vmul.f32 %v1364_v44, %v1326_v43  ;;  %vm1334_vm5 = vweird.f32 %v1364_v44 }
 0x163   :  { %vm1335_vm7 = vmor %vm1333_vm6, %vm1334_vm5 }
 0x164   :  { %v1329_v46 = vmul.f32 %v1364_v44, %v1328_v45 }
 0x166   :  { %v1330_v47 = vmul.f32 0.5, %v1329_v46 }
 0x168   :  { %v1331_v49 = vsub.f32 1.5, %v1330_v47 }
 0x16a   :  { %v1332_v50 = vmul.f32 %v1364_v44, %v1331_v49 }
 0x16c   :  { %v1336_v52 = vsel %vm1335_vm7, %v1364_v44, %v1332_v50 }
 0x16d   :  { %v1337_v54 = vmul.f32 %v1336_v52, %v1316_v33 }
 0x16f   :  { %v1339_v55 = vmul.f32 %v1338_v51, %v1337_v54 }
 0x171   :  { %v1341_v56 = vadd.f32 %v1340_v53, %v1339_v55 }
 0x173   :  { %1342 = vst.msk [vmem:[#allocation2] sm:$0xf] %vm1300_vm3, %v1341_v56 }
 0x174   :  { %1353 = dma.vmem_to_hbm [thread:$0]  %s1349_s23, 64, %s1351_s26, [#allocation3]  }
 0x175   :  { %1389 = dma.done.wait [#allocation3], 64  }
 0x176   :  { %1390 = vsyncadd [#allocation3], 4294967232 }
 0x177   :  { %1358 = vsyncpa [#allocation3], 1 }

</bundles_post_ra>
